<compile_context>
chip_gen: v7x
topology: tpu7x:2x2x1
jax: 0.10.0
libtpu: 0.0.40
codegen_flags: <defaults>
</compile_context>

<pallas_src>
import math

import jax
import jax.numpy as jnp
from jax.experimental import pallas as pl
from jax.experimental.pallas import tpu as pltpu


# --------------------------------------------------------------------------
# In-kernel helpers.
# --------------------------------------------------------------------------
def _layernorm(x, g, b, eps):
    mu = jnp.mean(x, axis=-1, keepdims=True)
    var = jnp.mean((x - mu) ** 2, axis=-1, keepdims=True)
    return (x - mu) * jax.lax.rsqrt(var + eps) * g + b


def _gelu(x):
    # TODO(synk): PyTorch nn.GELU default is erf-exact; tanh approximation used
    # here for TPU-safe lowering inside the kernel (~1e-3 difference).
    return jax.nn.gelu(x, approximate=True)


# --------------------------------------------------------------------------
# Pallas kernel: one encoder sub-layer for one (batch, query-tile) grid cell.
# --------------------------------------------------------------------------
def make_encoder_layer_kernel(num_heads: int, head_dim: int, eps: float):
    H, hd = num_heads, head_dim
    bf16 = jnp.bfloat16

    def kernel(xq_ref, x_ref, mask_ref,
               wq_ref, bq_ref, wkv_ref, bkv_ref, wo_ref, bo_ref,
               w1_ref, b1_ref, w2_ref, b2_ref,
               g1_ref, be1_ref, g2_ref, be2_ref,
               o_ref):
        x_all = x_ref[0]                       # (S, D)  bf16, full sequence (K/V source)
        xq = xq_ref[0]                         # (tq, D) bf16, query tile
        D = x_all.shape[-1]

        # Additive attention bias from the key mask (1 = attend, 0 = pad): (1, S).
        bias = (mask_ref[0] - 1.0) * 1e9

        # Full-width fused projections on the MXU (bf16 inputs, f32 accumulation).
        # 1/sqrt(head_dim) is already folded into wq/bq on the host.
        q = (jnp.dot(xq, wq_ref[...],
                     preferred_element_type=jnp.float32) + bq_ref[...]).astype(bf16)
        kv = (jnp.dot(x_all, wkv_ref[...],
                      preferred_element_type=jnp.float32) + bkv_ref[...]).astype(bf16)

        # Head split: static lane slices stacked on a new leading (batch) axis.
        qh = jnp.stack([q[:, h * hd:(h + 1) * hd] for h in range(H)], axis=0)
        kh = jnp.stack([kv[:, h * hd:(h + 1) * hd] for h in range(H)], axis=0)
        vh = jnp.stack([kv[:, D + h * hd:D + (h + 1) * hd] for h in range(H)], axis=0)

        # Scaled-dot-product attention, all heads batched on the MXU.
        s = jnp.einsum('hqd,hkd->hqk', qh, kh,
                       preferred_element_type=jnp.float32)          # (H, tq, S) f32
        sb = s + bias                                                # one VALU pass
        # Fused (bias-included) max subtraction feeding exp.  Because the bias is
        # inside the max, a fully-masked row still yields sum(p) >= 1 (no NaN).
        p = jnp.exp(sb - jnp.max(sb, axis=-1, keepdims=True))
        l = jnp.sum(p, axis=-1, keepdims=True)                       # (H, tq, 1)

        o = jnp.einsum('hqk,hkd->hqd', p.astype(bf16), vh,
                       preferred_element_type=jnp.float32)           # (H, tq, hd)
        # Normalize after PV: tq*hd multiplies per head instead of tq*S.
        o = o * pl.reciprocal(l, approx=True)

        # Head merge (lane concat) + single full-width output projection.
        attn_in = jnp.concatenate([o[h] for h in range(H)], axis=-1)  # (tq, D) f32
        attn = jnp.dot(attn_in.astype(bf16), wo_ref[...],
                       preferred_element_type=jnp.float32) + bo_ref[...]

        # Residual + LayerNorm 1 (f32; dropout = identity in eval mode).
        h1 = _layernorm(xq.astype(jnp.float32) + attn,
                        g1_ref[...], be1_ref[...], eps)

        # Feed-forward: Linear -> GELU -> Linear (bf16 matmuls, f32 accumulation).
        ff = jnp.dot(h1.astype(bf16), w1_ref[...],
                     preferred_element_type=jnp.float32) + b1_ref[...]
        ff = _gelu(ff)
        ff = jnp.dot(ff.astype(bf16), w2_ref[...],
                     preferred_element_type=jnp.float32) + b2_ref[...]

        # Residual + LayerNorm 2; activations carried between layers in bf16.
        o_ref[0] = _layernorm(h1 + ff, g2_ref[...], be2_ref[...], eps).astype(o_ref.dtype)

    return kernel


# --------------------------------------------------------------------------
# Generation-aware compiler params (3/4 of physical VMEM as the scoped limit).
# --------------------------------------------------------------------------
def _compiler_params():
    kwargs = dict(dimension_semantics=("parallel", "parallel"))
    try:
        cap = int(pltpu.get_tpu_info().vmem_capacity_bytes)
        kwargs["vmem_limit_bytes"] = (cap * 3) // 4   # headroom for compiler scratch
    except Exception:
        pass  # fall back to the compiler's default scoped-VMEM limit
    return pltpu.CompilerParams(**kwargs)


# --------------------------------------------------------------------------
# One-time host-side parameter prep (hoisted out of the per-layer forward).
# --------------------------------------------------------------------------
def prepare_params(params, num_heads: int):
    bf16 = jnp.bfloat16
    prepped = []
    for lp in params:
        D = lp["wq"].shape[0]
        hd = D // num_heads
        scale = 1.0 / math.sqrt(hd)
        prepped.append(dict(
            # Softmax scale folded into the Q projection; K|V packed full-width.
            wq=(lp["wq"] * scale).astype(bf16),
            bq=(lp["bq"] * scale).astype(jnp.float32),
            wkv=jnp.concatenate([lp["wk"], lp["wv"]], axis=1).astype(bf16),
            bkv=jnp.concatenate([lp["bk"], lp["bv"]], axis=1).astype(jnp.float32),
            wo=lp["wo"].astype(bf16), bo=lp["bo"].astype(jnp.float32),
            w1=lp["w1"].astype(bf16), b1=lp["b1"].astype(jnp.float32),
            w2=lp["w2"].astype(bf16), b2=lp["b2"].astype(jnp.float32),
            g1=lp["g1"], be1=lp["be1"], g2=lp["g2"], be2=lp["be2"],
        ))
    return prepped


# --------------------------------------------------------------------------
# Wrapper: one pallas_call per encoder layer, grid over (batch, query-tile).
# --------------------------------------------------------------------------
def encoder_layer(x, key_mask, pp, *, num_heads: int, eps: float):
    B, S, D = x.shape
    I = pp["w1"].shape[1]
    hd = D // num_heads
    kernel = make_encoder_layer_kernel(num_heads, hd, eps)

    # Query-tile axis: bounds the (H, tq, S) score slab in VMEM (flash-style for
    # the query dimension) and lets both v7x TensorCores work even when B == 1.
    # K/V are recomputed per tile; at production shapes consider caching them in
    # scratch with an 'arbitrary' tile axis, or a separate projection call.
    tq = min(S, 256)
    if S % tq != 0:
        tq = S  # TODO(synk): pad/mask ragged query tiles when S is not a multiple of 256
    n_qt = S // tq

    # Weights have constant index maps so they stay resident across the grid.
    # (pipeline_mode=pl.Buffered(1) would halve their VMEM footprint further.)
    def full(shape):
        return pl.BlockSpec(shape, lambda b, q: (0,) * len(shape))

    in_specs = [
        pl.BlockSpec((1, tq, D), lambda b, q: (b, q, 0)),   # query tile of x
        pl.BlockSpec((1, S, D), lambda b, q: (b, 0, 0)),    # full x (keys/values)
        pl.BlockSpec((1, 1, S), lambda b, q: (b, 0, 0)),    # key mask (1 = attend)
        full((D, D)), full((1, D)),                         # wq, bq (scale folded)
        full((D, 2 * D)), full((1, 2 * D)),                 # packed wk|wv, bk|bv
        full((D, D)), full((1, D)),                         # wo, bo
        full((D, I)), full((1, I)),                         # w1, b1
        full((I, D)), full((1, D)),                         # w2, b2
        full((1, D)), full((1, D)),                         # ln1 gamma, beta
        full((1, D)), full((1, D)),                         # ln2 gamma, beta
    ]

    # TODO(synk): for very large FFN intermediate sizes, stream w1/w2 over an
    # 'arbitrary' reduction grid axis instead of keeping them fully resident.
    return pl.pallas_call(
        kernel,
        out_shape=jax.ShapeDtypeStruct((B, S, D), jnp.bfloat16),
        grid_spec=pltpu.PrefetchScalarGridSpec(
            num_scalar_prefetch=0,
            grid=(B, n_qt),
            in_specs=in_specs,
            out_specs=pl.BlockSpec((1, tq, D), lambda b, q: (b, q, 0)),
        ),
        compiler_params=_compiler_params(),
    )(x, x, key_mask,
      pp["wq"], pp["bq"], pp["wkv"], pp["bkv"], pp["wo"], pp["bo"],
      pp["w1"], pp["b1"], pp["w2"], pp["b2"],
      pp["g1"], pp["be1"], pp["g2"], pp["be2"])


def sinusoidal_pe(seq_len: int, d_model: int):
    pos = jnp.arange(seq_len, dtype=jnp.float32)[:, None]
    i = jnp.arange(d_model // 2, dtype=jnp.float32)[None, :]
    angle = pos / jnp.power(10000.0, (2.0 * i) / d_model)
    pe = jnp.zeros((seq_len, d_model), jnp.float32)
    pe = pe.at[:, 0::2].set(jnp.sin(angle))
    pe = pe.at[:, 1::2].set(jnp.cos(angle))
    return pe


def transformer_encoder(src_embedding, prepped_params, attention_mask=None, *,
                        num_heads: int, layer_norm_eps: float = 1e-5,
                        use_positional_encoding: bool = True):
    """src_embedding: (B, S, D) float32.
       attention_mask: optional (B, S) with 1 = attend, 0 = pad."""
    B, S, D = src_embedding.shape
    x = src_embedding.astype(jnp.float32)
    if use_positional_encoding:
        x = x + sinusoidal_pe(S, D)[None, :, :]

    if attention_mask is None:
        key_mask = jnp.ones((B, 1, S), jnp.float32)
    else:
        key_mask = attention_mask.astype(jnp.float32).reshape(B, 1, S)

    # Inter-layer activations carried in bf16 (half the HBM traffic per layer);
    # all normalization math inside the kernel stays f32.
    x = x.astype(jnp.bfloat16)
    for pp in prepped_params:
        x = encoder_layer(x, key_mask, pp,
                          num_heads=num_heads, eps=layer_norm_eps)
    return x.astype(jnp.float32)


# --------------------------------------------------------------------------
# Deterministic parameter init (synthetic; shapes from the module __init__).
# --------------------------------------------------------------------------
def init_params(key, num_layers, d_model, intermediate_size):
    layers = []
    for _ in range(num_layers):
        key, *ks = jax.random.split(key, 8)
        w = lambda k, shape: jax.random.normal(k, shape, jnp.float32) * 0.02
        layers.append(dict(
            wq=w(ks[0], (d_model, d_model)), bq=jnp.zeros((1, d_model), jnp.float32),
            wk=w(ks[1], (d_model, d_model)), bk=jnp.zeros((1, d_model), jnp.float32),
            wv=w(ks[2], (d_model, d_model)), bv=jnp.zeros((1, d_model), jnp.float32),
            wo=w(ks[3], (d_model, d_model)), bo=jnp.zeros((1, d_model), jnp.float32),
            w1=w(ks[4], (d_model, intermediate_size)),
            b1=jnp.zeros((1, intermediate_size), jnp.float32),
            w2=w(ks[5], (intermediate_size, d_model)),
            b2=jnp.zeros((1, d_model), jnp.float32),
            g1=jnp.ones((1, d_model), jnp.float32), be1=jnp.zeros((1, d_model), jnp.float32),
            g2=jnp.ones((1, d_model), jnp.float32), be2=jnp.zeros((1, d_model), jnp.float32),
        ))
    return layers


# --------------------------------------------------------------------------
# Pure-JAX f32 reference (mirrors the module math) for a sanity check.
# --------------------------------------------------------------------------
def reference_encoder(x, params, *, num_heads, eps=1e-5):
    B, S, D = x.shape
    hd = D // num_heads
    x = x + sinusoidal_pe(S, D)[None]
    for lp in params:
        q = x @ lp["wq"] + lp["bq"]
        k = x @ lp["wk"] + lp["bk"]
        v = x @ lp["wv"] + lp["bv"]
        outs = []
        for h in range(num_heads):
            lo, hi = h * hd, (h + 1) * hd
            s = jnp.einsum("bqd,bkd->bqk", q[..., lo:hi], k[..., lo:hi]) / math.sqrt(hd)
            p = jax.nn.softmax(s, axis=-1)
            outs.append(jnp.einsum("bqk,bkd->bqd", p, v[..., lo:hi]))
        attn = jnp.concatenate(outs, axis=-1) @ lp["wo"] + lp["bo"]
        h1 = x + attn
        mu = jnp.mean(h1, -1, keepdims=True)
        var = jnp.mean((h1 - mu) ** 2, -1, keepdims=True)
        h1 = (h1 - mu) * jax.lax.rsqrt(var + eps) * lp["g1"] + lp["be1"]
        ff = jax.nn.gelu(h1 @ lp["w1"] + lp["b1"], approximate=True) @ lp["w2"] + lp["b2"]
        h2 = h1 + ff
        mu = jnp.mean(h2, -1, keepdims=True)
        var = jnp.mean((h2 - mu) ** 2, -1, keepdims=True)
        x = (h2 - mu) * jax.lax.rsqrt(var + eps) * lp["g2"] + lp["be2"]
    return x


if __name__ == "__main__":
    B, S, D = 2, 8, 32
    NUM_HEADS, INTERMEDIATE, NUM_LAYERS = 4, 64, 2
    EPS = 1e-5

    key = jax.random.PRNGKey(0)
    k_x, k_p = jax.random.split(key)
    x = jax.random.normal(k_x, (B, S, D), jnp.float32)
    params = init_params(k_p, NUM_LAYERS, D, INTERMEDIATE)
    prepped = prepare_params(params, NUM_HEADS)   # one-time host-side weight prep

    out = transformer_encoder(x, prepped, attention_mask=None,
                              num_heads=NUM_HEADS, layer_norm_eps=EPS,
                              use_positional_encoding=True)
    out = jax.block_until_ready(out)

    ref = reference_encoder(x, params, num_heads=NUM_HEADS, eps=EPS)
    assert out.shape == (B, S, D)
    assert jnp.allclose(out, ref, atol=5e-2, rtol=5e-2), \
        f"max abs diff {jnp.max(jnp.abs(out - ref))}"

    print("KERNEL_OK")
</pallas_src>

<mosaic_0001>
module attributes {stable_mosaic.version = 11 : i64} {
  func.func @kernel(%arg0: i32, %arg1: i32, %arg2: memref<1x8x32xbf16, #tpu.memory_space<vmem>>, %arg3: memref<1x8x32xbf16, #tpu.memory_space<vmem>>, %arg4: memref<1x1x8xf32, #tpu.memory_space<vmem>>, %arg5: memref<32x32xbf16, #tpu.memory_space<vmem>>, %arg6: memref<1x32xf32, #tpu.memory_space<vmem>>, %arg7: memref<32x64xbf16, #tpu.memory_space<vmem>>, %arg8: memref<1x64xf32, #tpu.memory_space<vmem>>, %arg9: memref<32x32xbf16, #tpu.memory_space<vmem>>, %arg10: memref<1x32xf32, #tpu.memory_space<vmem>>, %arg11: memref<32x64xbf16, #tpu.memory_space<vmem>>, %arg12: memref<1x64xf32, #tpu.memory_space<vmem>>, %arg13: memref<64x32xbf16, #tpu.memory_space<vmem>>, %arg14: memref<1x32xf32, #tpu.memory_space<vmem>>, %arg15: memref<1x32xf32, #tpu.memory_space<vmem>>, %arg16: memref<1x32xf32, #tpu.memory_space<vmem>>, %arg17: memref<1x32xf32, #tpu.memory_space<vmem>>, %arg18: memref<1x32xf32, #tpu.memory_space<vmem>>, %arg19: memref<1x8x32xbf16, #tpu.memory_space<vmem>>) attributes {dimension_semantics = [#tpu.dimension_semantics<parallel>, #tpu.dimension_semantics<parallel>], iteration_bounds = array<i64: 2, 1>, scalar_prefetch = 0 : i64, scratch_operands = 0 : i64, tpu.core_type = #tpu.core_type<tc>, window_params = [{transform_indices = @transform_0, window_bounds = array<i64: 1, 8, 32>}, {transform_indices = @transform_1, window_bounds = array<i64: 1, 8, 32>}, {transform_indices = @transform_2, window_bounds = array<i64: 1, 1, 8>}, {pipeline_mode = #tpu.pipeline_mode<synchronous>, transform_indices = @transform_3, window_bounds = array<i64: 32, 32>}, {pipeline_mode = #tpu.pipeline_mode<synchronous>, transform_indices = @transform_4, window_bounds = array<i64: 1, 32>}, {pipeline_mode = #tpu.pipeline_mode<synchronous>, transform_indices = @transform_5, window_bounds = array<i64: 32, 64>}, {pipeline_mode = #tpu.pipeline_mode<synchronous>, transform_indices = @transform_6, window_bounds = array<i64: 1, 64>}, {pipeline_mode = #tpu.pipeline_mode<synchronous>, transform_indices = @transform_7, window_bounds = array<i64: 32, 32>}, {pipeline_mode = #tpu.pipeline_mode<synchronous>, transform_indices = @transform_8, window_bounds = array<i64: 1, 32>}, {pipeline_mode = #tpu.pipeline_mode<synchronous>, transform_indices = @transform_9, window_bounds = array<i64: 32, 64>}, {pipeline_mode = #tpu.pipeline_mode<synchronous>, transform_indices = @transform_10, window_bounds = array<i64: 1, 64>}, {pipeline_mode = #tpu.pipeline_mode<synchronous>, transform_indices = @transform_11, window_bounds = array<i64: 64, 32>}, {pipeline_mode = #tpu.pipeline_mode<synchronous>, transform_indices = @transform_12, window_bounds = array<i64: 1, 32>}, {pipeline_mode = #tpu.pipeline_mode<synchronous>, transform_indices = @transform_13, window_bounds = array<i64: 1, 32>}, {pipeline_mode = #tpu.pipeline_mode<synchronous>, transform_indices = @transform_14, window_bounds = array<i64: 1, 32>}, {pipeline_mode = #tpu.pipeline_mode<synchronous>, transform_indices = @transform_15, window_bounds = array<i64: 1, 32>}, {pipeline_mode = #tpu.pipeline_mode<synchronous>, transform_indices = @transform_16, window_bounds = array<i64: 1, 32>}, {transform_indices = @transform_17, window_bounds = array<i64: 1, 8, 32>}]} {
    %c0 = arith.constant 0 : index
    %c0_0 = arith.constant 0 : index
    %c0_1 = arith.constant 0 : index
    %0 = vector.load %arg3[%c0, %c0_0, %c0_1] : memref<1x8x32xbf16, #tpu.memory_space<vmem>>, vector<1x8x32xbf16>
    %1 = vector.shape_cast %0 : vector<1x8x32xbf16> to vector<8x32xbf16>
    %c0_2 = arith.constant 0 : index
    %c0_3 = arith.constant 0 : index
    %c0_4 = arith.constant 0 : index
    %2 = vector.load %arg2[%c0_2, %c0_3, %c0_4] : memref<1x8x32xbf16, #tpu.memory_space<vmem>>, vector<1x8x32xbf16>
    %3 = vector.shape_cast %2 : vector<1x8x32xbf16> to vector<8x32xbf16>
    %c0_5 = arith.constant 0 : index
    %c0_6 = arith.constant 0 : index
    %c0_7 = arith.constant 0 : index
    %4 = vector.load %arg4[%c0_5, %c0_6, %c0_7] : memref<1x1x8xf32, #tpu.memory_space<vmem>>, vector<1x1x8xf32>
    %5 = vector.shape_cast %4 : vector<1x1x8xf32> to vector<1x8xf32>
    %cst = arith.constant 1.000000e+00 : f32
    %6 = vector.broadcast %cst : f32 to vector<1x8xf32>
    %7 = arith.subf %5, %6 : vector<1x8xf32>
    %cst_8 = arith.constant 1.000000e+09 : f32
    %8 = vector.broadcast %cst_8 : f32 to vector<1x8xf32>
    %9 = arith.mulf %7, %8 : vector<1x8xf32>
    %c0_9 = arith.constant 0 : index
    %c0_10 = arith.constant 0 : index
    %10 = vector.load %arg5[%c0_9, %c0_10] : memref<32x32xbf16, #tpu.memory_space<vmem>>, vector<32x32xbf16>
    %cst_11 = arith.constant dense<0.000000e+00> : vector<8x32xf32>
    %11 = tpu.matmul %3, %10, %cst_11 {dimension_numbers = #tpu.dot_dimension_numbers<[1], [0], [0], [1], [0, 0, 1, 1], [], []>} : vector<8x32xbf16>, vector<32x32xbf16>, vector<8x32xf32> -> vector<8x32xf32>
    %c0_12 = arith.constant 0 : index
    %c0_13 = arith.constant 0 : index
    %12 = vector.load %arg6[%c0_12, %c0_13] : memref<1x32xf32, #tpu.memory_space<vmem>>, vector<1x32xf32>
    %13 = vector.broadcast %12 : vector<1x32xf32> to vector<8x32xf32>
    %14 = arith.addf %11, %13 : vector<8x32xf32>
    %15 = arith.truncf %14 : vector<8x32xf32> to vector<8x32xbf16>
    %c0_14 = arith.constant 0 : index
    %c0_15 = arith.constant 0 : index
    %16 = vector.load %arg7[%c0_14, %c0_15] : memref<32x64xbf16, #tpu.memory_space<vmem>>, vector<32x64xbf16>
    %cst_16 = arith.constant dense<0.000000e+00> : vector<8x64xf32>
    %17 = tpu.matmul %1, %16, %cst_16 {dimension_numbers = #tpu.dot_dimension_numbers<[1], [0], [0], [1], [0, 0, 1, 1], [], []>} : vector<8x32xbf16>, vector<32x64xbf16>, vector<8x64xf32> -> vector<8x64xf32>
    %c0_17 = arith.constant 0 : index
    %c0_18 = arith.constant 0 : index
    %18 = vector.load %arg8[%c0_17, %c0_18] : memref<1x64xf32, #tpu.memory_space<vmem>>, vector<1x64xf32>
    %19 = vector.broadcast %18 : vector<1x64xf32> to vector<8x64xf32>
    %20 = arith.addf %17, %19 : vector<8x64xf32>
    %21 = arith.truncf %20 : vector<8x64xf32> to vector<8x64xbf16>
    %22 = vector.extract_strided_slice %15 {offsets = [0, 0], sizes = [8, 8], strides = [1, 1]} : vector<8x32xbf16> to vector<8x8xbf16>
    %23 = vector.extract_strided_slice %15 {offsets = [0, 8], sizes = [8, 8], strides = [1, 1]} : vector<8x32xbf16> to vector<8x8xbf16>
    %24 = vector.extract_strided_slice %15 {offsets = [0, 16], sizes = [8, 8], strides = [1, 1]} : vector<8x32xbf16> to vector<8x8xbf16>
    %25 = vector.extract_strided_slice %15 {offsets = [0, 24], sizes = [8, 8], strides = [1, 1]} : vector<8x32xbf16> to vector<8x8xbf16>
    %26 = vector.shape_cast %22 : vector<8x8xbf16> to vector<1x8x8xbf16>
    %27 = vector.shape_cast %23 : vector<8x8xbf16> to vector<1x8x8xbf16>
    %28 = vector.shape_cast %24 : vector<8x8xbf16> to vector<1x8x8xbf16>
    %29 = vector.shape_cast %25 : vector<8x8xbf16> to vector<1x8x8xbf16>
    %30 = tpu.concatenate %26, %27, %28, %29 in 0 : vector<1x8x8xbf16>, vector<1x8x8xbf16>, vector<1x8x8xbf16>, vector<1x8x8xbf16> -> vector<4x8x8xbf16>
    %31 = vector.extract_strided_slice %21 {offsets = [0, 0], sizes = [8, 8], strides = [1, 1]} : vector<8x64xbf16> to vector<8x8xbf16>
    %32 = vector.extract_strided_slice %21 {offsets = [0, 8], sizes = [8, 8], strides = [1, 1]} : vector<8x64xbf16> to vector<8x8xbf16>
    %33 = vector.extract_strided_slice %21 {offsets = [0, 16], sizes = [8, 8], strides = [1, 1]} : vector<8x64xbf16> to vector<8x8xbf16>
    %34 = vector.extract_strided_slice %21 {offsets = [0, 24], sizes = [8, 8], strides = [1, 1]} : vector<8x64xbf16> to vector<8x8xbf16>
    %35 = vector.shape_cast %31 : vector<8x8xbf16> to vector<1x8x8xbf16>
    %36 = vector.shape_cast %32 : vector<8x8xbf16> to vector<1x8x8xbf16>
    %37 = vector.shape_cast %33 : vector<8x8xbf16> to vector<1x8x8xbf16>
    %38 = vector.shape_cast %34 : vector<8x8xbf16> to vector<1x8x8xbf16>
    %39 = tpu.concatenate %35, %36, %37, %38 in 0 : vector<1x8x8xbf16>, vector<1x8x8xbf16>, vector<1x8x8xbf16>, vector<1x8x8xbf16> -> vector<4x8x8xbf16>
    %40 = vector.extract_strided_slice %21 {offsets = [0, 32], sizes = [8, 8], strides = [1, 1]} : vector<8x64xbf16> to vector<8x8xbf16>
    %41 = vector.extract_strided_slice %21 {offsets = [0, 40], sizes = [8, 8], strides = [1, 1]} : vector<8x64xbf16> to vector<8x8xbf16>
    %42 = vector.extract_strided_slice %21 {offsets = [0, 48], sizes = [8, 8], strides = [1, 1]} : vector<8x64xbf16> to vector<8x8xbf16>
    %43 = vector.extract_strided_slice %21 {offsets = [0, 56], sizes = [8, 8], strides = [1, 1]} : vector<8x64xbf16> to vector<8x8xbf16>
    %44 = vector.shape_cast %40 : vector<8x8xbf16> to vector<1x8x8xbf16>
    %45 = vector.shape_cast %41 : vector<8x8xbf16> to vector<1x8x8xbf16>
    %46 = vector.shape_cast %42 : vector<8x8xbf16> to vector<1x8x8xbf16>
    %47 = vector.shape_cast %43 : vector<8x8xbf16> to vector<1x8x8xbf16>
    %48 = tpu.concatenate %44, %45, %46, %47 in 0 : vector<1x8x8xbf16>, vector<1x8x8xbf16>, vector<1x8x8xbf16>, vector<1x8x8xbf16> -> vector<4x8x8xbf16>
    "tpu.trace_start"() <{level = 10 : i32, message = "hqd,hkd->hqk"}> : () -> ()
    %cst_19 = arith.constant dense<0.000000e+00> : vector<4x8x8xf32>
    %49 = tpu.matmul %30, %39, %cst_19 {dimension_numbers = #tpu.dot_dimension_numbers<[2], [2], [1], [1], [0, 0, 0, 1, 1, 1], [0], [0]>} : vector<4x8x8xbf16>, vector<4x8x8xbf16>, vector<4x8x8xf32> -> vector<4x8x8xf32>
    "tpu.trace_stop"() : () -> ()
    %50 = vector.shape_cast %9 : vector<1x8xf32> to vector<1x1x8xf32>
    %51 = vector.broadcast %50 : vector<1x1x8xf32> to vector<4x8x8xf32>
    %52 = arith.addf %49, %51 : vector<4x8x8xf32>
    %cst_20 = arith.constant dense<0xFF800000> : vector<4x8xf32>
    %53 = vector.multi_reduction <maximumf>, %52, %cst_20 [2] : vector<4x8x8xf32> to vector<4x8xf32>
    %54 = vector.shape_cast %53 : vector<4x8xf32> to vector<4x8x1xf32>
    %55 = vector.broadcast %54 : vector<4x8x1xf32> to vector<4x8x8xf32>
    %56 = arith.subf %52, %55 : vector<4x8x8xf32>
    %57 = math.exp %56 : vector<4x8x8xf32>
    %cst_21 = arith.constant dense<0.000000e+00> : vector<4x8xf32>
    %58 = vector.multi_reduction <add>, %57, %cst_21 [2] : vector<4x8x8xf32> to vector<4x8xf32>
    %59 = vector.shape_cast %58 : vector<4x8xf32> to vector<4x8x1xf32>
    %60 = arith.truncf %57 : vector<4x8x8xf32> to vector<4x8x8xbf16>
    "tpu.trace_start"() <{level = 10 : i32, message = "hqk,hkd->hqd"}> : () -> ()
    %cst_22 = arith.constant dense<0.000000e+00> : vector<4x8x8xf32>
    %61 = tpu.matmul %60, %48, %cst_22 {dimension_numbers = #tpu.dot_dimension_numbers<[2], [1], [1], [2], [0, 0, 0, 1, 1, 2], [0], [0]>} : vector<4x8x8xbf16>, vector<4x8x8xbf16>, vector<4x8x8xf32> -> vector<4x8x8xf32>
    "tpu.trace_stop"() : () -> ()
    %62 = tpu.reciprocal %59 {approx = true} : vector<4x8x1xf32> -> vector<4x8x1xf32>
    %63 = vector.broadcast %62 : vector<4x8x1xf32> to vector<4x8x8xf32>
    %64 = arith.mulf %61, %63 : vector<4x8x8xf32>
    %65 = vector.extract_strided_slice %64 {offsets = [0, 0, 0], sizes = [1, 8, 8], strides = [1, 1, 1]} : vector<4x8x8xf32> to vector<1x8x8xf32>
    %66 = vector.shape_cast %65 : vector<1x8x8xf32> to vector<8x8xf32>
    %67 = vector.extract_strided_slice %64 {offsets = [1, 0, 0], sizes = [1, 8, 8], strides = [1, 1, 1]} : vector<4x8x8xf32> to vector<1x8x8xf32>
    %68 = vector.shape_cast %67 : vector<1x8x8xf32> to vector<8x8xf32>
    %69 = vector.extract_strided_slice %64 {offsets = [2, 0, 0], sizes = [1, 8, 8], strides = [1, 1, 1]} : vector<4x8x8xf32> to vector<1x8x8xf32>
    %70 = vector.shape_cast %69 : vector<1x8x8xf32> to vector<8x8xf32>
    %71 = vector.extract_strided_slice %64 {offsets = [3, 0, 0], sizes = [1, 8, 8], strides = [1, 1, 1]} : vector<4x8x8xf32> to vector<1x8x8xf32>
    %72 = vector.shape_cast %71 : vector<1x8x8xf32> to vector<8x8xf32>
    %73 = tpu.concatenate %66, %68, %70, %72 in 1 : vector<8x8xf32>, vector<8x8xf32>, vector<8x8xf32>, vector<8x8xf32> -> vector<8x32xf32>
    %74 = arith.truncf %73 : vector<8x32xf32> to vector<8x32xbf16>
    %c0_23 = arith.constant 0 : index
    %c0_24 = arith.constant 0 : index
    %75 = vector.load %arg9[%c0_23, %c0_24] : memref<32x32xbf16, #tpu.memory_space<vmem>>, vector<32x32xbf16>
    %cst_25 = arith.constant dense<0.000000e+00> : vector<8x32xf32>
    %76 = tpu.matmul %74, %75, %cst_25 {dimension_numbers = #tpu.dot_dimension_numbers<[1], [0], [0], [1], [0, 0, 1, 1], [], []>} : vector<8x32xbf16>, vector<32x32xbf16>, vector<8x32xf32> -> vector<8x32xf32>
    %c0_26 = arith.constant 0 : index
    %c0_27 = arith.constant 0 : index
    %77 = vector.load %arg10[%c0_26, %c0_27] : memref<1x32xf32, #tpu.memory_space<vmem>>, vector<1x32xf32>
    %78 = vector.broadcast %77 : vector<1x32xf32> to vector<8x32xf32>
    %79 = arith.addf %76, %78 : vector<8x32xf32>
    %80 = arith.extf %3 : vector<8x32xbf16> to vector<8x32xf32>
    %81 = arith.addf %80, %79 : vector<8x32xf32>
    %c0_28 = arith.constant 0 : index
    %c0_29 = arith.constant 0 : index
    %82 = vector.load %arg15[%c0_28, %c0_29] : memref<1x32xf32, #tpu.memory_space<vmem>>, vector<1x32xf32>
    %c0_30 = arith.constant 0 : index
    %c0_31 = arith.constant 0 : index
    %83 = vector.load %arg16[%c0_30, %c0_31] : memref<1x32xf32, #tpu.memory_space<vmem>>, vector<1x32xf32>
    %cst_32 = arith.constant dense<0.000000e+00> : vector<8xf32>
    %84 = vector.multi_reduction <add>, %81, %cst_32 [1] : vector<8x32xf32> to vector<8xf32>
    %85 = vector.shape_cast %84 : vector<8xf32> to vector<8x1xf32>
    %cst_33 = arith.constant 3.200000e+01 : f32
    %86 = vector.broadcast %cst_33 : f32 to vector<8x1xf32>
    %87 = arith.divf %85, %86 : vector<8x1xf32>
    %88 = vector.broadcast %87 : vector<8x1xf32> to vector<8x32xf32>
    %89 = arith.subf %81, %88 : vector<8x32xf32>
    %90 = arith.mulf %89, %89 : vector<8x32xf32>
    %cst_34 = arith.constant dense<0.000000e+00> : vector<8xf32>
    %91 = vector.multi_reduction <add>, %90, %cst_34 [1] : vector<8x32xf32> to vector<8xf32>
    %92 = vector.shape_cast %91 : vector<8xf32> to vector<8x1xf32>
    %cst_35 = arith.constant 3.200000e+01 : f32
    %93 = vector.broadcast %cst_35 : f32 to vector<8x1xf32>
    %94 = arith.divf %92, %93 : vector<8x1xf32>
    %95 = vector.broadcast %87 : vector<8x1xf32> to vector<8x32xf32>
    %96 = arith.subf %81, %95 : vector<8x32xf32>
    %cst_36 = arith.constant 9.99999974E-6 : f32
    %97 = vector.broadcast %cst_36 : f32 to vector<8x1xf32>
    %98 = arith.addf %94, %97 : vector<8x1xf32>
    %99 = math.rsqrt %98 : vector<8x1xf32>
    %100 = vector.broadcast %99 : vector<8x1xf32> to vector<8x32xf32>
    %101 = arith.mulf %96, %100 : vector<8x32xf32>
    %102 = vector.broadcast %82 : vector<1x32xf32> to vector<8x32xf32>
    %103 = arith.mulf %101, %102 : vector<8x32xf32>
    %104 = vector.broadcast %83 : vector<1x32xf32> to vector<8x32xf32>
    %105 = arith.addf %103, %104 : vector<8x32xf32>
    %106 = arith.truncf %105 : vector<8x32xf32> to vector<8x32xbf16>
    %c0_37 = arith.constant 0 : index
    %c0_38 = arith.constant 0 : index
    %107 = vector.load %arg11[%c0_37, %c0_38] : memref<32x64xbf16, #tpu.memory_space<vmem>>, vector<32x64xbf16>
    %cst_39 = arith.constant dense<0.000000e+00> : vector<8x64xf32>
    %108 = tpu.matmul %106, %107, %cst_39 {dimension_numbers = #tpu.dot_dimension_numbers<[1], [0], [0], [1], [0, 0, 1, 1], [], []>} : vector<8x32xbf16>, vector<32x64xbf16>, vector<8x64xf32> -> vector<8x64xf32>
    %c0_40 = arith.constant 0 : index
    %c0_41 = arith.constant 0 : index
    %109 = vector.load %arg12[%c0_40, %c0_41] : memref<1x64xf32, #tpu.memory_space<vmem>>, vector<1x64xf32>
    %110 = vector.broadcast %109 : vector<1x64xf32> to vector<8x64xf32>
    %111 = arith.addf %108, %110 : vector<8x64xf32>
    %112 = arith.mulf %111, %111 : vector<8x64xf32>
    %113 = arith.mulf %111, %112 : vector<8x64xf32>
    %cst_42 = arith.constant 4.471500e-02 : f32
    %114 = vector.broadcast %cst_42 : f32 to vector<8x64xf32>
    %115 = arith.mulf %114, %113 : vector<8x64xf32>
    %116 = arith.addf %111, %115 : vector<8x64xf32>
    %cst_43 = arith.constant 0.797884583 : f32
    %117 = vector.broadcast %cst_43 : f32 to vector<8x64xf32>
    %118 = arith.mulf %117, %116 : vector<8x64xf32>
    %119 = math.tanh %118 : vector<8x64xf32>
    %cst_44 = arith.constant 1.000000e+00 : f32
    %120 = vector.broadcast %cst_44 : f32 to vector<8x64xf32>
    %121 = arith.addf %120, %119 : vector<8x64xf32>
    %cst_45 = arith.constant 5.000000e-01 : f32
    %122 = vector.broadcast %cst_45 : f32 to vector<8x64xf32>
    %123 = arith.mulf %122, %121 : vector<8x64xf32>
    %124 = arith.mulf %111, %123 : vector<8x64xf32>
    %125 = arith.truncf %124 : vector<8x64xf32> to vector<8x64xbf16>
    %c0_46 = arith.constant 0 : index
    %c0_47 = arith.constant 0 : index
    %126 = vector.load %arg13[%c0_46, %c0_47] : memref<64x32xbf16, #tpu.memory_space<vmem>>, vector<64x32xbf16>
    %cst_48 = arith.constant dense<0.000000e+00> : vector<8x32xf32>
    %127 = tpu.matmul %125, %126, %cst_48 {dimension_numbers = #tpu.dot_dimension_numbers<[1], [0], [0], [1], [0, 0, 1, 1], [], []>} : vector<8x64xbf16>, vector<64x32xbf16>, vector<8x32xf32> -> vector<8x32xf32>
    %c0_49 = arith.constant 0 : index
    %c0_50 = arith.constant 0 : index
    %128 = vector.load %arg14[%c0_49, %c0_50] : memref<1x32xf32, #tpu.memory_space<vmem>>, vector<1x32xf32>
    %129 = vector.broadcast %128 : vector<1x32xf32> to vector<8x32xf32>
    %130 = arith.addf %127, %129 : vector<8x32xf32>
    %131 = arith.addf %105, %130 : vector<8x32xf32>
    %c0_51 = arith.constant 0 : index
    %c0_52 = arith.constant 0 : index
    %132 = vector.load %arg17[%c0_51, %c0_52] : memref<1x32xf32, #tpu.memory_space<vmem>>, vector<1x32xf32>
    %c0_53 = arith.constant 0 : index
    %c0_54 = arith.constant 0 : index
    %133 = vector.load %arg18[%c0_53, %c0_54] : memref<1x32xf32, #tpu.memory_space<vmem>>, vector<1x32xf32>
    %cst_55 = arith.constant dense<0.000000e+00> : vector<8xf32>
    %134 = vector.multi_reduction <add>, %131, %cst_55 [1] : vector<8x32xf32> to vector<8xf32>
    %135 = vector.shape_cast %134 : vector<8xf32> to vector<8x1xf32>
    %cst_56 = arith.constant 3.200000e+01 : f32
    %136 = vector.broadcast %cst_56 : f32 to vector<8x1xf32>
    %137 = arith.divf %135, %136 : vector<8x1xf32>
    %138 = vector.broadcast %137 : vector<8x1xf32> to vector<8x32xf32>
    %139 = arith.subf %131, %138 : vector<8x32xf32>
    %140 = arith.mulf %139, %139 : vector<8x32xf32>
    %cst_57 = arith.constant dense<0.000000e+00> : vector<8xf32>
    %141 = vector.multi_reduction <add>, %140, %cst_57 [1] : vector<8x32xf32> to vector<8xf32>
    %142 = vector.shape_cast %141 : vector<8xf32> to vector<8x1xf32>
    %cst_58 = arith.constant 3.200000e+01 : f32
    %143 = vector.broadcast %cst_58 : f32 to vector<8x1xf32>
    %144 = arith.divf %142, %143 : vector<8x1xf32>
    %145 = vector.broadcast %137 : vector<8x1xf32> to vector<8x32xf32>
    %146 = arith.subf %131, %145 : vector<8x32xf32>
    %cst_59 = arith.constant 9.99999974E-6 : f32
    %147 = vector.broadcast %cst_59 : f32 to vector<8x1xf32>
    %148 = arith.addf %144, %147 : vector<8x1xf32>
    %149 = math.rsqrt %148 : vector<8x1xf32>
    %150 = vector.broadcast %149 : vector<8x1xf32> to vector<8x32xf32>
    %151 = arith.mulf %146, %150 : vector<8x32xf32>
    %152 = vector.broadcast %132 : vector<1x32xf32> to vector<8x32xf32>
    %153 = arith.mulf %151, %152 : vector<8x32xf32>
    %154 = vector.broadcast %133 : vector<1x32xf32> to vector<8x32xf32>
    %155 = arith.addf %153, %154 : vector<8x32xf32>
    %156 = arith.truncf %155 : vector<8x32xf32> to vector<8x32xbf16>
    %c0_60 = arith.constant 0 : index
    %c0_61 = arith.constant 0 : index
    %c0_62 = arith.constant 0 : index
    %157 = vector.load %arg19[%c0_60, %c0_61, %c0_62] : memref<1x8x32xbf16, #tpu.memory_space<vmem>>, vector<1x8x32xbf16>
    %158 = vector.shape_cast %157 : vector<1x8x32xbf16> to vector<8x32xbf16>
    %159 = vector.shape_cast %156 : vector<8x32xbf16> to vector<1x8x32xbf16>
    tpu.vector_store %arg19[%c0_60, %c0_61, %c0_62], %159 {strides = array<i32>} : memref<1x8x32xbf16, #tpu.memory_space<vmem>>, vector<1x8x32xbf16>,
    return
  }
  func.func @transform_0(%arg0: i32, %arg1: i32) -> (i32, i32, i32) {
    %c0_i32 = arith.constant 0 : i32
    %c0_i32_0 = arith.constant 0 : i32
    return %arg0, %arg1, %c0_i32 : i32, i32, i32
  }
  func.func @transform_1(%arg0: i32, %arg1: i32) -> (i32, i32, i32) {
    %c0_i32 = arith.constant 0 : i32
    %c0_i32_0 = arith.constant 0 : i32
    %c0_i32_1 = arith.constant 0 : i32
    return %arg0, %c0_i32, %c0_i32_0 : i32, i32, i32
  }
  func.func @transform_2(%arg0: i32, %arg1: i32) -> (i32, i32, i32) {
    %c0_i32 = arith.constant 0 : i32
    %c0_i32_0 = arith.constant 0 : i32
    %c0_i32_1 = arith.constant 0 : i32
    return %arg0, %c0_i32, %c0_i32_0 : i32, i32, i32
  }
  func.func @transform_3(%arg0: i32, %arg1: i32) -> (i32, i32) {
    %c0_i32 = arith.constant 0 : i32
    %c0_i32_0 = arith.constant 0 : i32
    %c0_i32_1 = arith.constant 0 : i32
    return %c0_i32, %c0_i32_0 : i32, i32
  }
  func.func @transform_4(%arg0: i32, %arg1: i32) -> (i32, i32) {
    %c0_i32 = arith.constant 0 : i32
    %c0_i32_0 = arith.constant 0 : i32
    %c0_i32_1 = arith.constant 0 : i32
    return %c0_i32, %c0_i32_0 : i32, i32
  }
  func.func @transform_5(%arg0: i32, %arg1: i32) -> (i32, i32) {
    %c0_i32 = arith.constant 0 : i32
    %c0_i32_0 = arith.constant 0 : i32
    %c0_i32_1 = arith.constant 0 : i32
    return %c0_i32, %c0_i32_0 : i32, i32
  }
  func.func @transform_6(%arg0: i32, %arg1: i32) -> (i32, i32) {
    %c0_i32 = arith.constant 0 : i32
    %c0_i32_0 = arith.constant 0 : i32
    %c0_i32_1 = arith.constant 0 : i32
    return %c0_i32, %c0_i32_0 : i32, i32
  }
  func.func @transform_7(%arg0: i32, %arg1: i32) -> (i32, i32) {
    %c0_i32 = arith.constant 0 : i32
    %c0_i32_0 = arith.constant 0 : i32
    %c0_i32_1 = arith.constant 0 : i32
    return %c0_i32, %c0_i32_0 : i32, i32
  }
  func.func @transform_8(%arg0: i32, %arg1: i32) -> (i32, i32) {
    %c0_i32 = arith.constant 0 : i32
    %c0_i32_0 = arith.constant 0 : i32
    %c0_i32_1 = arith.constant 0 : i32
    return %c0_i32, %c0_i32_0 : i32, i32
  }
  func.func @transform_9(%arg0: i32, %arg1: i32) -> (i32, i32) {
    %c0_i32 = arith.constant 0 : i32
    %c0_i32_0 = arith.constant 0 : i32
    %c0_i32_1 = arith.constant 0 : i32
    return %c0_i32, %c0_i32_0 : i32, i32
  }
  func.func @transform_10(%arg0: i32, %arg1: i32) -> (i32, i32) {
    %c0_i32 = arith.constant 0 : i32
    %c0_i32_0 = arith.constant 0 : i32
    %c0_i32_1 = arith.constant 0 : i32
    return %c0_i32, %c0_i32_0 : i32, i32
  }
  func.func @transform_11(%arg0: i32, %arg1: i32) -> (i32, i32) {
    %c0_i32 = arith.constant 0 : i32
    %c0_i32_0 = arith.constant 0 : i32
    %c0_i32_1 = arith.constant 0 : i32
    return %c0_i32, %c0_i32_0 : i32, i32
  }
  func.func @transform_12(%arg0: i32, %arg1: i32) -> (i32, i32) {
    %c0_i32 = arith.constant 0 : i32
    %c0_i32_0 = arith.constant 0 : i32
    %c0_i32_1 = arith.constant 0 : i32
    return %c0_i32, %c0_i32_0 : i32, i32
  }
  func.func @transform_13(%arg0: i32, %arg1: i32) -> (i32, i32) {
    %c0_i32 = arith.constant 0 : i32
    %c0_i32_0 = arith.constant 0 : i32
    %c0_i32_1 = arith.constant 0 : i32
    return %c0_i32, %c0_i32_0 : i32, i32
  }
  func.func @transform_14(%arg0: i32, %arg1: i32) -> (i32, i32) {
    %c0_i32 = arith.constant 0 : i32
    %c0_i32_0 = arith.constant 0 : i32
    %c0_i32_1 = arith.constant 0 : i32
    return %c0_i32, %c0_i32_0 : i32, i32
  }
  func.func @transform_15(%arg0: i32, %arg1: i32) -> (i32, i32) {
    %c0_i32 = arith.constant 0 : i32
    %c0_i32_0 = arith.constant 0 : i32
    %c0_i32_1 = arith.constant 0 : i32
    return %c0_i32, %c0_i32_0 : i32, i32
  }
  func.func @transform_16(%arg0: i32, %arg1: i32) -> (i32, i32) {
    %c0_i32 = arith.constant 0 : i32
    %c0_i32_0 = arith.constant 0 : i32
    %c0_i32_1 = arith.constant 0 : i32
    return %c0_i32, %c0_i32_0 : i32, i32
  }
  func.func @transform_17(%arg0: i32, %arg1: i32) -> (i32, i32, i32) {
    %c0_i32 = arith.constant 0 : i32
    %c0_i32_0 = arith.constant 0 : i32
    return %arg0, %arg1, %c0_i32 : i32, i32, i32
  }
}

</mosaic_0001>

<bundles_post_ra>
// kernel: tpu_custom_call.1
= control target key start
LH: loop header
LB: loop body
LE: loop exit
PB: predicated region body
PF: predicated region fallthrough
CT: control target
= control target key end

     0   :  { %s2853_s0 = inlined_call_operand.hbm [shape: bf16[2,8,32], index: 0, kind: input, shape index: {}]   ;;  %s2854_s1 = inlined_call_operand.hbm [shape: bf16[2,8,32], index: 1, kind: input, shape index: {}]   ;;  %s2855_s2 = inlined_call_operand.vmem [shape: f32[2,1,8], index: 2, kind: input, shape index: {}]   ;;  %s2856_s3 = inlined_call_operand.vmem [shape: bf16[32,32], index: 3, kind: input, shape index: {}]   ;;  %s2857_s4 = inlined_call_operand.hbm [shape: f32[1,32], index: 4, kind: input, shape index: {}]   ;;  %s2858_s5 = inlined_call_operand.vmem [shape: bf16[32,64], index: 5, kind: input, shape index: {}]   ;;  %s2859_s6 = inlined_call_operand.hbm [shape: f32[1,64], index: 6, kind: input, shape index: {}]   ;;  %s2860_s7 = inlined_call_operand.vmem [shape: bf16[32,32], index: 7, kind: input, shape index: {}]   ;;  %s2861_s8 = inlined_call_operand.hbm [shape: f32[1,32], index: 8, kind: input, shape index: {}]   ;;  %s2862_s9 = inlined_call_operand.vmem [shape: bf16[32,64], index: 9, kind: input, shape index: {}]   ;;  %s2863_s10 = inlined_call_operand.vmem [shape: f32[1,64], index: 10, kind: input, shape index: {}]   ;;  %s2864_s11 = inlined_call_operand.vmem [shape: bf16[64,32], index: 11, kind: input, shape index: {}]   ;;  %s2865_s12 = inlined_call_operand.vmem [shape: f32[1,32], index: 12, kind: input, shape index: {}]   ;;  %s2866_s13 = inlined_call_operand.vmem [shape: f32[1,32], index: 13, kind: input, shape index: {}]   ;;  %s2867_s14 = inlined_call_operand.vmem [shape: f32[1,32], index: 14, kind: input, shape index: {}]   ;;  %s2868_s15 = inlined_call_operand.vmem [shape: f32[1,32], index: 15, kind: input, shape index: {}]   ;;  %s2869_s16 = inlined_call_operand.vmem [shape: f32[1,32], index: 16, kind: input, shape index: {}]   ;;  %s2870_s17 = inlined_call_operand.hbm [shape: bf16[2,8,32], index: 17, kind: output, shape index: {}]  }
   0x1   :  { %2884 = sst [smem:[#allocation23_spill]] %s2853_s0 }
   0x2   :  { %2885 = sst [smem:[#allocation24_spill]] %s2854_s1 }
   0x3   :  { %2886 = sst [smem:[#allocation25_spill]] %s2857_s4 }
   0x4   :  { %2887 = sst [smem:[#allocation26_spill]] %s2859_s6 }
   0x5   :  { %2888 = sst [smem:[#allocation27_spill]] %s2861_s8 }
   0x6   :  { %2889 = sst [smem:[#allocation28_spill]] %s2863_s10 }
   0x7   :  { %2890 = sst [smem:[#allocation29_spill]] %s2864_s11 }
   0x8   :  { %2891 = sst [smem:[#allocation30_spill]] %s2865_s12 }
   0x9   :  { %2892 = sst [smem:[#allocation31_spill]] %s2867_s14 }
   0xa   :  { %2893 = sst [smem:[#allocation32_spill]] %s2868_s15 }
   0xb   :  { %2894 = sst [smem:[#allocation33_spill]] %s2869_s16 }
   0xc   :  { %2895 = sst [smem:[#allocation34_spill]] %s2870_s17 }
   0xd   :  { %22 = vsyncpa [#allocation3], 0 }
   0xe   :  { %24 = vsyncpa [#allocation3 + $0x1], 0 }
   0xf   :  { %25 = vsyncpa [#allocation6], 0 }
  0x10   :  { %27 = vsyncpa [#allocation6 + $0x1], 0 }
  0x11   :  { %28 = vsyncpa [#allocation9], 0 }
  0x12   :  { %29 = vsyncpa [#allocation4], 0 }
  0x13   :  { %31 = vsyncpa [#allocation4 + $0x1], 0  ;;  %s2388_s24 = smov 0   ;;  %s2390_s25 = smov 0  }
  0x14   :  { %s2392_s26 = smov 0   ;;  %s2394_s27 = smov 0  }
  0x15   :  { %s2396_s28 = smov 0   ;;  %s2398_s29 = smov 0  }
  0x16 LB: > { %2896 = sst [smem:[#allocation17_spill]] %s2261_s24  ;;  %s2419_s0 = sadd.s32 4294967295, %s2281_s29   ;;  %s2281_s29 = sphi %s2398_s29, %s37_s29   ;;  %s2277_s28 = sphi %s2396_s28, %s2936_s28   ;;  %s2273_s27 = sphi %s2394_s27, %s2935_s27   ;;  %s2269_s26 = sphi %s2392_s26, %s2939_s26   ;;  %s2265_s25 = sphi %s2390_s25, %s2938_s25   ;;  %s2261_s24 = sphi %s2388_s24, %s2937_s24  }
  0x17   : > { %2897 = sst [smem:[#allocation18_spill]] %s2269_s26  ;;  %s1721_s30 = sadd.s32 4294967294, %s2281_s29  }
  0x18   : > { %2898 = sst [smem:[#allocation19_spill]] %s2277_s28  ;;  %p71_p0 = scmp.ne.s32.totalorder %s2265_s25, %s2261_s24 }
  0x19   : > { %p2876_p1 = scmp.eq.s32.totalorder %s2419_s0, 0  ;;  %p449_p3 = scmp.eq.s32.totalorder %s1721_s30, 1 }
  0x1a   : > { %p1722_p5 = scmp.ge.s32.totalorder %s2281_s29, 1  ;;  %p456_p7 = scmp.lt.s32.totalorder %s2281_s29, 3 }
  0x1b   : > { %p2428_p4 = por %p2876_p1, %p71_p0  ;;  %p2433_p6 = por %p449_p3, %p71_p0 }
  0x1c   : > { %p2438_p8 = pnand %p1722_p5, %p456_p7  ;;  %s2283_s20 = smov [#allocation7]  }
  0x1d   : > { %s2899_s18 = scalar_select %p2428_p4, 1, 0 }
  0x1e   : > { %s2900_s19 = scalar_select %p2433_p6, 1, 0 }
  0x1f   : > { %s2902_s1 = scalar_select %p2438_p8, 1, 0 }
  0x20   : > { %2901 = sst [smem:[#allocation20_spill]] %s2900_s19  ;;  %s472_s21 = sshll.u32 %s2283_s20, 4  ;;  %s473_s21 = int_to_ptr.vmem [resolvable:$true] %s472_s21 }
  0x21   : > { %p1920_p10 = pneg %p2438_p8  ;;  %s2284_s22 = smov [#allocation8]  }
  0x22   : > { %s486_s23 = sshll.u32 %s2284_s22, 4  ;;  %s2285_s19 = smov [#allocation10]   ;;  %s2451_s23 = int_to_ptr.vmem [resolvable:$true] %s486_s23 }
  0x23   : > { %p2447_p11 = pnand %p1920_p10, %p2876_p1  ;;  %s500_s24 = sshll.u32 %s2285_s19, 4  ;;  %s2453_s24 = int_to_ptr.vmem [resolvable:$true] %s500_s24 }
  0x24   : > { %s2904_s4 = sld [smem:[#allocation25_spill]] }
  0x25   : > { %p2463_p13 = pneg %p2447_p11 }
  0x2a   : > { %s2043_s16 = scalar_lea.hbm %s2904_s4, 16 }
  0x2b   : > { %p2044_p12 = scmp.ne.s32.totalorder %s2904_s4, %s2043_s16  ;;  %p2050_p5 = scmp.lt.u32.totalorder %s2043_s16, %s2904_s4 }
  0x2d   : > { %p2046_p0 = pnand %p2463_p13, %p2044_p12 }
  0x2f   : > { %p2047_p3 = pneg %p2046_p0 }
  0x31   : > { %p2052_p7 = pnand %p2050_p5, %p2047_p3 }
  0x33   : > { %2055 = shalt.err (!%p2052_p7)
}
  0x34   : > { %s2056_s17 = scalar_lea.vmem %s473_s21, 16  ;;  %s2063_s12 = scalar_lea.vmem %s473_s21, 32 }
  0x35   : > { %p2057_p10 = scmp.ne.s32.totalorder %s473_s21, %s2056_s17  ;;  %p2064_p2 = scmp.lt.s32.totalorder %s473_s21, %s473_s21 }
  0x36   : > { %p2065_p6 = scmp.lt.s32.totalorder %s2063_s12, %s2056_s17 }
  0x37   : > { %p2059_p9 = pnand %p2057_p10, %p2463_p13 }
  0x38   : > { %p2066_p4 = por %p2065_p6, %p2064_p2 }
  0x39   : > { %p2060_p1 = pneg %p2059_p9 }
  0x3b   : > { %p2067_p8 = pnand %p2066_p4, %p2060_p1 }
  0x3d   : > { %2070 = shalt.err (!%p2067_p8)
}
  0x3e   : > { %1923 = dma.hbm_to_vmem [thread:$0]  (!%p2447_p11), %s2904_s4, 16, %s473_s21, [#allocation6]  }
  0x3f   : > { %s2906_s6 = sld [smem:[#allocation26_spill]] }
  0x45   : > { %s2071_s19 = scalar_lea.hbm %s2906_s6, 16 }
  0x46   : > { %p2072_p9 = scmp.ne.s32.totalorder %s2906_s6, %s2071_s19  ;;  %p2078_p1 = scmp.lt.u32.totalorder %s2071_s19, %s2906_s6 }
  0x48   : > { %p2074_p12 = pnand %p2072_p9, %p2463_p13 }
  0x4a   : > { %p2075_p2 = pneg %p2074_p12 }
  0x4c   : > { %p2080_p4 = pnand %p2078_p1, %p2075_p2 }
  0x4e   : > { %2083 = shalt.err (!%p2080_p4)
}
  0x4f   : > { %s2084_s21 = scalar_lea.vmem %s2451_s23, 16  ;;  %s2091_s11 = scalar_lea.vmem %s2451_s23, 32 }
  0x50   : > { %p2085_p6 = scmp.ne.s32.totalorder %s2451_s23, %s2084_s21  ;;  %p2092_p3 = scmp.lt.s32.totalorder %s2451_s23, %s2451_s23 }
  0x51   : > { %p2093_p5 = scmp.lt.s32.totalorder %s2091_s11, %s2084_s21 }
  0x52   : > { %p2087_p8 = pnand %p2085_p6, %p2463_p13 }
  0x53   : > { %p2094_p7 = por %p2093_p5, %p2092_p3 }
  0x54   : > { %p2088_p0 = pneg %p2087_p8 }
  0x56   : > { %p2095_p10 = pnand %p2094_p7, %p2088_p0 }
  0x58   : > { %2098 = shalt.err (!%p2095_p10)
}
  0x59   : > { %1926 = dma.hbm_to_vmem [thread:$0]  (!%p2447_p11), %s2906_s6, 16, %s2451_s23, [#allocation9]  }
  0x5a   : > { %s2907_s8 = sld [smem:[#allocation27_spill]] }
  0x60   : > { %s2099_s16 = scalar_lea.hbm %s2907_s8, 16 }
  0x61   : > { %p2100_p9 = scmp.ne.s32.totalorder %s2907_s8, %s2099_s16  ;;  %p2106_p1 = scmp.lt.u32.totalorder %s2099_s16, %s2907_s8 }
  0x63   : > { %p2102_p12 = pnand %p2100_p9, %p2463_p13 }
  0x65   : > { %p2103_p2 = pneg %p2102_p12 }
  0x67   : > { %p2108_p4 = pnand %p2106_p1, %p2103_p2 }
  0x69   : > { %2111 = shalt.err (!%p2108_p4)
}
  0x6a   : > { %s2112_s23 = scalar_lea.vmem %s2453_s24, 16  ;;  %s2119_s11 = scalar_lea.vmem %s2453_s24, 32 }
  0x6b   : > { %p2113_p6 = scmp.ne.s32.totalorder %s2453_s24, %s2112_s23  ;;  %p2120_p3 = scmp.lt.s32.totalorder %s2453_s24, %s2453_s24 }
  0x6c   : > { %p2121_p5 = scmp.lt.s32.totalorder %s2119_s11, %s2112_s23 }
  0x6d   : > { %p2115_p8 = pnand %p2113_p6, %p2463_p13 }
  0x6e   : > { %p2122_p7 = por %p2121_p5, %p2120_p3 }
  0x6f   : > { %p2116_p0 = pneg %p2115_p8 }
  0x71   : > { %p2123_p10 = pnand %p2122_p7, %p2116_p0 }
  0x73   : > { %2126 = shalt.err (!%p2123_p10)
}
  0x74   : > { %1929 = dma.hbm_to_vmem [thread:$0]  (!%p2447_p11), %s2907_s8, 16, %s2453_s24, [#allocation9]  }
  0x75   : > { %s58_s22 = sadd.s32 1, %s2269_s26  ;;  %s49_s20 = sadd.s32 1, %s2277_s28 }
  0x76   : > { %p65_p13 = scmp.ne.s32.totalorder %s2269_s26, %s2265_s25  ;;  %p51_p9 = scmp.ge.s32.totalorder %s49_s20, 2 }
  0x77   : > { %p66_p12 = scmp.eq.s32.totalorder %s2281_s29, 0  ;;  %p2908_p2 = scmp.eq.s32.totalorder %s2419_s0, 1 }
  0x78   : > { %p1944_p4 = scmp.lt.s32.totalorder %s2281_s29, 2  ;;  %s2941_s20 = smov (%p51_p9, %s49_s20), 0 }
  0x79   : > { %p2534_p1 = por %p2908_p2, %p65_p13  ;;  %2910 = sst [smem:[#allocation21_spill]] %s2941_s20 }
  0x7a   : > { %p67_p6 = por %p66_p12, %p65_p13  ;;  %s535_s10 = sand.u32 1, %s2269_s26  }
  0x7b   : > { %s2909_s30 = scalar_select %p2534_p1, 1, 0 }
  0x7c   : > { %s53_s16 = ssub.s32 %s2277_s28, %s2941_s20  ;;  %s2544_s24 = sshll.u32 %s535_s10, 2 }
  0x7d   : > { %p56_p11 = scmp.eq.s32.totalorder %s53_s16, 0  ;;  %s1728_s19 = sshll.u32 %s2277_s28, 6 }
  0x7e   : > { %s2912_s23 = sld [smem:[#allocation23_spill]]  ;;  %s539_s14 = scalar_lea.vmem [#allocation2], %s2544_s24 }
  0x7f   : > { %s2548_s17 = scalar_select %p56_p11, %s2269_s26, %s58_s22  }
  0x80   : > { %s547_s15 = sshll.u32 %s539_s14, 4  ;;  %p2560_p8 = pnand %p1944_p4, %p67_p6  ;;  %s2556_s15 = int_to_ptr.vmem [resolvable:$true] %s547_s15 }
  0x81   : > { %2911 = sst [smem:[#allocation22_spill]] %s2548_s17  ;;  %s2914_s6 = sld [smem:[#allocation24_spill]] }
  0x82   : > { %s554_s21 = sand.u32 1, %s2281_s29   ;;  %s536_s8 = scalar_lea.sflag [#allocation3], %s535_s10 }
  0x83   : > { %p2129_p3 = pneg %p2560_p8 }
  0x84   : > { %s2553_s11 = scalar_lea.hbm %s2912_s23, %s1728_s19  ;;  %s2132_s17 = scalar_lea.hbm %s2912_s23, 128 }
  0x85   : > { %s2127_s20 = scalar_lea.hbm %s2553_s11, 64  ;;  %p2133_p10 = scmp.lt.u32.totalorder %s2553_s11, %s2912_s23 }
  0x86   : > { %p2128_p0 = scmp.ne.s32.totalorder %s2553_s11, %s2127_s20  ;;  %p2134_p13 = scmp.lt.u32.totalorder %s2132_s17, %s2127_s20 }
  0x87   : > { %s2567_s12 = scalar_lea.hbm %s2914_s6, %s1728_s19  ;;  %p2136_p12 = scmp.lt.u32.totalorder %s2127_s20, %s2553_s11 }
  0x88   : > { %p2130_p5 = pnand %p2129_p3, %p2128_p0  ;;  %p2135_p9 = por %p2134_p13, %p2133_p10 }
  0x8a   : > { %p2131_p7 = pneg %p2130_p5  ;;  %p2137_p2 = por %p2136_p12, %p2135_p9 }
  0x8c   : > { %p2138_p4 = pnand %p2137_p2, %p2131_p7 }
  0x8e   : > { %2141 = shalt.err (!%p2138_p4)
}
  0x8f   : > { %s2142_s10 = scalar_lea.vmem %s2556_s15, 64  ;;  %s2286_s28 = smov [#allocation2]  }
  0x90   : > { %p2143_p6 = scmp.ne.s32.totalorder %s2556_s15, %s2142_s10  ;;  %s2147_s19 = sshll.u32 %s2286_s28, 4  ;;  %s2148_s19 = int_to_ptr.vmem [resolvable:$false] %s2147_s19 }
  0x91   : > { %s2149_s26 = scalar_lea.vmem %s2148_s19, 128  ;;  %p2150_p5 = scmp.lt.s32.totalorder %s2556_s15, %s2148_s19 }
  0x92   : > { %p2145_p11 = pnand %p2143_p6, %p2129_p3  ;;  %p2151_p10 = scmp.lt.s32.totalorder %s2149_s26, %s2142_s10 }
  0x94   : > { %p2146_p0 = pneg %p2145_p11  ;;  %p2152_p13 = por %p2151_p10, %p2150_p5 }
  0x96   : > { %p2153_p9 = pnand %p2152_p13, %p2146_p0 }
  0x98   : > { %2156 = shalt.err (!%p2153_p9)
}
  0x99   : > { %1933 = dma.hbm_to_vmem [thread:$0]  (!%p2560_p8), %s2553_s11, 64, %s2556_s15, %s536_s8  }
  0x9a   : > { %s558_s20 = scalar_lea.vmem [#allocation5], %s2544_s24  ;;  %s555_s22 = scalar_lea.sflag [#allocation6], %s554_s21 }
  0x9b   : > { %s565_s17 = sshll.u32 %s558_s20, 4  ;;  %s2157_s14 = scalar_lea.hbm %s2567_s12, 64  ;;  %s566_s17 = int_to_ptr.vmem [resolvable:$true] %s565_s17 }
  0x9c   : > { %p2158_p7 = scmp.ne.s32.totalorder %s2567_s12, %s2157_s14  ;;  %s2162_s28 = scalar_lea.hbm %s2914_s6, 128 }
  0x9d   : > { %p2163_p4 = scmp.lt.u32.totalorder %s2567_s12, %s2914_s6  ;;  %p2164_p6 = scmp.lt.u32.totalorder %s2162_s28, %s2157_s14 }
  0x9e   : > { %p2160_p12 = pnand %p2158_p7, %p2129_p3  ;;  %p2166_p0 = scmp.lt.u32.totalorder %s2157_s14, %s2567_s12 }
  0x9f   : > { %p2165_p11 = por %p2164_p6, %p2163_p4 }
  0xa0   : > { %p2161_p2 = pneg %p2160_p12 }
  0xa1   : > { %p2167_p5 = por %p2166_p0, %p2165_p11 }
  0xa3   : > { %p2168_p10 = pnand %p2167_p5, %p2161_p2 }
  0xa5   : > { %2171 = shalt.err (!%p2168_p10)
}
  0xa6   : > { %s2172_s8 = scalar_lea.vmem %s566_s17, 64  ;;  %s2287_s24 = smov [#allocation5]  }
  0xa7   : > { %p2173_p13 = scmp.ne.s32.totalorder %s566_s17, %s2172_s8  ;;  %s2177_s11 = sshll.u32 %s2287_s24, 4  ;;  %s2178_s11 = int_to_ptr.vmem [resolvable:$false] %s2177_s11 }
  0xa8   : > { %s2179_s15 = scalar_lea.vmem %s2178_s11, 128  ;;  %p2180_p12 = scmp.lt.s32.totalorder %s566_s17, %s2178_s11 }
  0xa9   : > { %p2175_p9 = pnand %p2173_p13, %p2129_p3  ;;  %p2181_p1 = scmp.lt.s32.totalorder %s2179_s15, %s2172_s8 }
  0xab   : > { %p2176_p7 = pneg %p2175_p9  ;;  %p2182_p4 = por %p2181_p1, %p2180_p12 }
  0xad   : > { %p2183_p6 = pnand %p2182_p4, %p2176_p7 }
  0xaf   : > { %2186 = shalt.err (!%p2183_p6)
}
  0xb0   : > { %1936 = dma.hbm_to_vmem [thread:$0]  (!%p2560_p8), %s2567_s12, 64, %s566_s17, %s555_s22  }
  0xb1   : > { %p2915_p2 = scmp.ne.s32.totalorder %s2902_s1, 0 }
  0xb2   : > { %s2620_s21 = sand.u32 (!%p2915_p2), 1, %s2265_s25   ;;  %p2916_p1 = scmp.ne.s32.totalorder (!%p2915_p2), %s2899_s18, 0 }
  0xb3   : > { %580 = sbr.rel (%p2915_p2) target bundleno = 2587 (0xa1b), region = 88  ;;  %s2623_s20 = sshll.u32 (!%p2915_p2), %s2620_s21, 2 }
  0xb4   : > { %s583_s14 = scalar_lea.sflag (!%p2915_p2), [#allocation3], %s2620_s21  ;;  %s586_s4 = scalar_lea.vmem (!%p2915_p2), [#allocation2], %s2623_s20 }
  0xba   : > { %2240 = dma.done.wait (%p2916_p1), %s583_s14, 64  }
  0xbb   : > { %2242 = vsyncadd (%p2916_p1), %s583_s14, 4294967232  ;;  %s591_s1 = sand.u32 1, %s2419_s0   ;;  %s595_s12 = scalar_lea.vmem [#allocation5], %s2623_s20 }
  0xbc   : > { %s592_s16 = scalar_lea.sflag [#allocation6], %s591_s1 }
  0xbd   : > { %2244 = dma.done.wait (%p2916_p1), %s592_s16, 64  }
  0xbe   : > { %2246 = vsyncadd (%p2916_p1), %s592_s16, 4294967232  ;;  %p2917_p8 = scmp.eq.s32.totalorder %s2419_s0, 0 }
  0xc0   : > { %2248 = dma.done.wait (%p2917_p8), [#allocation6], 16   ;;  %p2918_p3 = pmov %p2917_p8 }
  0xc2   : > { %2250 = vsyncadd (%p2918_p3), [#allocation6], 4294967280  ;;  %p2919_p11 = pmov %p2918_p3 }
  0xc3   : > { %p2920_p0 = pmov %p2918_p3 }
  0xc4   : > { %2252 = dma.done.wait (%p2919_p11), [#allocation9], 32  }
  0xc5   : > { %2254 = vsyncadd (%p2920_p0), [#allocation9], 4294967264  ;;  %v2288_v0 = vmov 0.0   ;;  %vm2289_vm0 = vmmov 0   ;;  %v2009_v1 = vld [vmem:[%s2856_s3] sm:$0xff]   ;;  %v2010_v2 = vld [vmem:[%s2856_s3 + $0x8] sm:$0xff]   ;;  %v825_v33 = vlaneseq }
  0xc6   : > { %1810 = vmatprep.subr.bf16.mxu1 %v2288_v0  ;;  %1814 = vmatprep.mubr.msk.bf16.mxu1 %vm2289_vm0, %v2288_v0  ;;  %v2658_v3 = vld [vmem:[%s586_s4] sm:$0xf]  ;;  %vm698_vm1 = vcmask 261120   ;;  %v2012_v5 = vld [vmem:[%s2858_s5 + $0x8] sm:$0xff]   ;;  %v1739_v7 = vld [vmem:[#allocation7] ss:$0 sm:$0xff] }
  0xc7   : > { %1826 = vmatprep.subr.bf16.mxu0 %v2288_v0  ;;  %1828 = vmatprep.mubr.msk.bf16.mxu0 %vm2289_vm0, %v2288_v0  ;;  %v2011_v4 = vld [vmem:[%s2858_s5] sm:$0xff]   ;;  %v670_v6 = vld [vmem:[%s595_s12] sm:$0xf]  ;;  %s2290_s8 = smov 120   ;;  %v1743_v14 = vld [vmem:[#allocation8] ss:$0 sm:$0xff] }
  0xc8   : > { %1811 = vmatpush3.bf16.msra.mxu1 %v2009_v1  ;;  %vm830_vm2 = vcmask 64512   ;;  %s2291_s24 = smov 104   ;;  %s2292_s11 = smov 112   ;;  %vm1060_vm3 = vcmask 1043456   ;;  %v826_v36 = vshrl.u32 %v825_v33, 7  ;;  %vm1269_vm4 = vcmask 130048  }
  0xc9   : > { %1812 = vmatprep.subr.bf16.mxu1 %v2288_v0  ;;  %s2293_s15 = smov 96   ;;  %p666_p5 = scmp.lt.s32.totalorder %s2273_s27, 1  ;;  %vm1271_vm5 = vcmask 195584   ;;  %vm1488_vm6 = vcmask 523264   ;;  %vm1563_vm7 = vcmask 257024  }
  0xca   : > { %v827_v38 = vsub.s32 0, %v826_v36  ;;  %s2294_s0 = smov 8   ;;  %s2295_s10 = smov 16  }
  0xcb   : > { %s667_s14 = scalar_select %p666_p5, %s2273_s27, 1 }
  0xcc   : > { %1813 = vmatpush3.bf16.msra.mxu1 %v2010_v2  ;;  %s2296_s28 = smov 24   ;;  %s2921_s1 = sld [smem:[#allocation31_spill]] }
  0xcd   : > { %1818 = vmatprep.subr.bf16.mxu1 %v2288_v0  ;;  %s668_s16 = scalar_lea.vmem %s2855_s2, %s667_s14  ;;  %s2922_s18 = sld [smem:[#allocation29_spill]] }
  0xce   : > { %v672_v34 = vld [vmem:[%s668_s16] sm:$0x1]  ;;  %s2924_s14 = sld [smem:[#allocation30_spill]]  ;;  %s2925_s16 = sld [smem:[#allocation32_spill]] }
  0xcf   : > { %1815 = vmatmul.mubr.msk.bf16.vlgmr.msra.gmra.mrb[0].mxu1 %vm698_vm1, %v2658_v3  ;;  %v1738_v35 = vadd.f32 -1.0, %v672_v34  ;;  %s2926_s22 = sld [smem:[#allocation33_spill]]  ;;  %p2928_p13 = scmp.ne.s32.totalorder %s2909_s30, 0 }
  0xd0   : > { %1819 = vmatpush3.bf16.msra.mxu1 %v2011_v4  ;;  %1822 = vmatprep.mubr.msk.bf16.mxu1 %vm2289_vm0, %v2288_v0 }
  0xd1   : > { %1820 = vmatprep.subr.bf16.mxu1 %v2288_v0  ;;  %v674_v37 = vmul.f32 1e+09, %v1738_v35 }
  0xd3   : > { %v828_v39 = vrot.slane %v674_v37, %v827_v38  ;;  %v2013_v38 = vld [vmem:[%s2860_s7] sm:$0xff]  }
  0xd4   : > { %1821 = vmatpush3.bf16.msra.mxu1 %v2012_v5 }
  0xd5   : > { %1832 = vmatprep.subr.bf16.mxu1 %v2288_v0 }
  0xd7   : > { %1823 = vmatmul.mubr.msk.bf16.vlgmr.msra.gmra.mrb[4].mxu1 %vm698_vm1, %v670_v6 }
  0xd8   : > { %1834 = vmatprep.mubr.msk.bf16.mxu1 %vm2289_vm0, %v2288_v0 }
 0x1a2   : > { %v736_v8 = vpop.f32.mrb[0].mxu1 }
 0x1a3   : > { %v737_v9 = vadd.f32 %v1739_v7, %v736_v8  ;;  %v1816_v10 = vpop.f32.mrb[1].mxu1 }
 0x1a4   : > { %v739_v11 = vpop.f32.mrb[2].mxu1 }
 0x1a5   : > { %v742_v12 = vpack.c.bf16 %v737_v9, %v737_v9  ;;  %v1817_v13 = vpop.f32.mrb[3].mxu1 }
 0x1a7   : > { %811 = vrot.lane.b32.xlu1 %v742_v12, %s2290_s8 }
 0x1aa   : > { %v803_v15 = vpop.f32.mrb[4].mxu1 }
 0x1ab   : > { %v804_v16 = vadd.f32 %v1743_v14, %v803_v15  ;;  %v1824_v17 = vpop.f32.mrb[5].mxu1 }
 0x1ac   : > { %v806_v18 = vpop.f32.mrb[6].mxu1 }
 0x1ad   : > { %v809_v19 = vpack.c.bf16 %v804_v16, %v804_v16  ;;  %v1825_v20 = vpop.f32.mrb[7].mxu1 }
 0x1af   : > { %822 = vrot.lane.b32.xlu1 %v809_v19, %s2291_s24  ;;  %818 = vrot.lane.b32.xlu0 %v809_v19, %s2290_s8  ;;  %v835_v21 = vsel %vm830_vm2, %v809_v19, 0  ;;  %s2927_s8 = sld [smem:[#allocation34_spill]] }
 0x1b0   : > { %1827 = vmatpush3.bf16.xpose.msra.mxu0 %v835_v21 }
 0x1b1   : > { %1838 = vmatprep.subr.bf16.mxu0 %v2288_v0 }
 0x1b3   : > { %815 = vrot.lane.b32.xlu1 %v742_v12, %s2291_s24  ;;  %820 = vrot.lane.b32.xlu0 %v809_v19, %s2292_s11  ;;  %s2923_s24 = sld [smem:[#allocation28_spill]] }
 0x1b7   : > { %1055 = vrot.lane.b32.xlu1 %v809_v19, %s2293_s15  ;;  %813 = vrot.lane.b32.xlu0 %v742_v12, %s2292_s11  ;;  %s1566_s11 = scalar_lea.sflag [#allocation4], %s2620_s21 }
 0x1b8   : > { %1829 = vmatmul.mubr.msk.bf16.vlgmr.msra.gmra.mrb[0].mxu0 %vm830_vm2, %v742_v12 }
 0x1b9   : > { %1840 = vmatprep.mubr.msk.bf16.mxu0 %vm2289_vm0, %v2288_v0 }
 0x219   : > { %v812_v22 = vpop.permute.xlu1 %811 }
 0x221   : > { %v2682_v23 = vpop.permute.xlu1 %822  ;;  %v2684_v24 = vpop.permute.xlu0 %818 }
 0x222   : > { %v881_v25 = vsel %vm830_vm2, %v2684_v24, 0  ;;  %v973_v29 = vsel %vm830_vm2, %v2682_v23, 0 }
 0x223   : > { %1833 = vmatpush3.bf16.xpose.msra.mxu1 %v881_v25 }
 0x224   : > { %1844 = vmatprep.subr.bf16.mxu1 %v2288_v0 }
 0x225   : > { %v816_v26 = vpop.permute.xlu1 %815  ;;  %v821_v27 = vpop.permute.xlu0 %820 }
 0x226   : > { %v927_v28 = vsel %vm830_vm2, %v821_v27, 0 }
 0x227   : > { %1839 = vmatpush3.bf16.xpose.msra.mxu0 %v927_v28 }
 0x228   : > { %1850 = vmatprep.subr.bf16.mxu0 %v2288_v0 }
 0x229   : > { %v1056_v30 = vpop.permute.xlu1 %1055  ;;  %v814_v31 = vpop.permute.xlu0 %813 }
 0x22a   : > { %1835 = vmatmul.mubr.msk.bf16.vlgmr.msra.gmra.mrb[8].mxu1 %vm830_vm2, %v812_v22  ;;  %v1062_v32 = vsel %vm1060_vm3, %v1056_v30, 0 }
 0x22b   : > { %1845 = vmatpush3.bf16.xpose.msra.mxu1 %v973_v29  ;;  %1846 = vmatprep.mubr.msk.bf16.mxu1 %vm2289_vm0, %v2288_v0 }
 0x22c   : > { %1856 = vmatprep.subr.bf16.mxu1 %v2288_v0 }
 0x22e   : > { %1841 = vmatmul.mubr.msk.bf16.vlgmr.msra.gmra.mrb[4].mxu0 %vm830_vm2, %v814_v31 }
 0x22f   : > { %1851 = vmatpush3.bf16.msra.mxu0 %v1062_v32  ;;  %1852 = vmatprep.mubr.msk.bf16.mxu0 %vm2289_vm0, %v2288_v0 }
 0x230   : > { %1862 = vmatprep.subr.bf16.mxu0 %v2288_v0 }
 0x232   : > { %1847 = vmatmul.mubr.msk.bf16.vlgmr.msra.gmra.mrb[12].mxu1 %vm830_vm2, %v816_v26 }
 0x233   : > { %1858 = vmatprep.mubr.msk.bf16.mxu1 %vm2289_vm0, %v2288_v0 }
 0x28b   : > { %v871_v40 = vpop.f32.mrb[0].mxu0 }
 0x28c   : > { %v872_v41 = vadd.f32 %v871_v40, %v828_v39  ;;  %v1830_v42 = vpop.f32.mrb[1].mxu0  ;;  %v2014_v40 = vld [vmem:[%s2860_s7 + $0x8] sm:$0xff]  }
 0x28d   : > { %v874_v43 = vpop.f32.mrb[2].mxu0 }
 0x28e   : > { %v1831_v44 = vpop.f32.mrb[3].mxu0  ;;  %v1015_v45 = vsel %vm830_vm2, %v872_v41, -inf }
 0x28f   : > { %1016 = vmax.xlane.f32.xlu0 %v1015_v45 }
 0x2fd   : > { %v917_v46 = vpop.f32.mrb[8].mxu1 }
 0x2fe   : > { %v918_v47 = vadd.f32 %v917_v46, %v828_v39  ;;  %v1836_v48 = vpop.f32.mrb[9].mxu1 }
 0x2ff   : > { %v920_v49 = vpop.f32.mrb[10].mxu1 }
 0x300   : > { %v1837_v50 = vpop.f32.mrb[11].mxu1  ;;  %v1018_v51 = vsel %vm830_vm2, %v918_v47, -inf }
 0x301   : > { %v963_v52 = vpop.f32.mrb[4].mxu0  ;;  %1019 = vmax.xlane.f32.xlu1 %v1018_v51 }
 0x302   : > { %v964_v53 = vadd.f32 %v963_v52, %v828_v39  ;;  %v1842_v54 = vpop.f32.mrb[5].mxu0 }
 0x303   : > { %v966_v55 = vpop.f32.mrb[6].mxu0 }
 0x304   : > { %v1843_v56 = vpop.f32.mrb[7].mxu0  ;;  %v1021_v57 = vsel %vm830_vm2, %v964_v53, -inf }
 0x305   : > { %1022 = vmax.xlane.f32.xlu0 %v1021_v57  ;;  %v1009_v58 = vpop.f32.mrb[12].mxu1 }
 0x306   : > { %v1010_v59 = vadd.f32 %v1009_v58, %v828_v39  ;;  %v1848_v60 = vpop.f32.mrb[13].mxu1 }
 0x307   : > { %v1012_v61 = vpop.f32.mrb[14].mxu1 }
 0x308   : > { %v1849_v62 = vpop.f32.mrb[15].mxu1  ;;  %v1024_v63 = vsel %vm830_vm2, %v1010_v59, -inf }
 0x309   : > { %1025 = vmax.xlane.f32.xlu0 %v1024_v63 }
 0x312   : > { %1152 = vrot.lane.b32.xlu1 %v821_v27, %s2293_s15 }
 0x316   : > { %1200 = vrot.lane.b32.xlu1 %v2682_v23, %s2293_s15 }
 0x31c   : > { %v1017_v1 = vpop.xlane.xlu0 %1016 }
 0x31d   : > { %v1027_v2 = vsub.f32 %v872_v41, %v1017_v1 }
 0x31f   : > { %v1031_v4 = vmul.f32 1.442695, %v1027_v2  ;;  %1104 = vrot.lane.b32.xlu0 %v2684_v24, %s2293_s15 }
 0x321   : > { %2021 = vpow2.f32 %v1031_v4 }
 0x32b   : > { %v2022_v5 = vpop.eup %2021 }
 0x32c   : > { %v1051_v6 = vpack.c.bf16 %v2022_v5, %v2022_v5  ;;  %v1039_v31 = vsel %vm830_vm2, %v2022_v5, 0.0 }
 0x32e   : > { %1853 = vmatmul.mubr.msk.bf16.vlgmr.msra.gmra.mrb[8].mxu0 %vm830_vm2, %v1051_v6 }
 0x32f   : > { %1864 = vmatprep.mubr.msk.bf16.mxu0 %vm2289_vm0, %v2288_v0 }
 0x38e   : > { %v1020_v7 = vpop.xlane.xlu1 %1019 }
 0x38f   : > { %v1028_v8 = vsub.f32 %v918_v47, %v1020_v7  ;;  %v1755_v7 = vld [vmem:[#allocation10] ss:$0 sm:$0xff] }
 0x391   : > { %v1033_v9 = vmul.f32 1.442695, %v1028_v8  ;;  %v1340_v8 = vunpack.c.l.bf16 %v2658_v3  ;;  %v2015_v3 = vld [vmem:[%s2862_s9] sm:$0xff]  }
 0x392   : > { %v1023_v10 = vpop.xlane.xlu0 %1022  ;;  %v1153_v11 = vpop.permute.xlu1 %1152 }
 0x393   : > { %2023 = vpow2.f32 %v1033_v9  ;;  %v1029_v12 = vsub.f32 %v964_v53, %v1023_v10  ;;  %v1158_v13 = vsel %vm1060_vm3, %v1153_v11, 0 }
 0x394   : > { %1863 = vmatpush3.bf16.msra.mxu0 %v1158_v13 }
 0x395   : > { %v1035_v14 = vmul.f32 1.442695, %v1029_v12  ;;  %1874 = vmatprep.subr.bf16.mxu0 %v2288_v0 }
 0x396   : > { %v1026_v15 = vpop.xlane.xlu0 %1025  ;;  %v1201_v21 = vpop.permute.xlu1 %1200 }
 0x397   : > { %2025 = vpow2.f32 %v1035_v14  ;;  %v1030_v16 = vsub.f32 %v1010_v59, %v1026_v15  ;;  %v1206_v24 = vsel %vm1060_vm3, %v1201_v21, 0  ;;  %v2016_v21 = vld [vmem:[%s2862_s9 + $0x8] sm:$0xff]  }
 0x399   : > { %v1037_v17 = vmul.f32 1.442695, %v1030_v16 }
 0x39a   : > { %v1105_v18 = vpop.permute.xlu0 %1104 }
 0x39b   : > { %2027 = vpow2.f32 %v1037_v17  ;;  %v1110_v19 = vsel %vm1060_vm3, %v1105_v18, 0 }
 0x39c   : > { %1857 = vmatpush3.bf16.msra.mxu1 %v1110_v19 }
 0x39d   : > { %v2024_v20 = vpop.eup %2023  ;;  %1868 = vmatprep.subr.bf16.mxu1 %v2288_v0 }
 0x39e   : > { %v1042_v22 = vsel %vm830_vm2, %v2024_v20, 0.0  ;;  %v1052_v23 = vpack.c.bf16 %v2024_v20, %v2024_v20 }
 0x39f   : > { %1043 = vadd.xlane.f32.xlu0 %v1042_v22 }
 0x3a0   : > { %1859 = vmatmul.mubr.msk.bf16.vlgmr.msra.gmra.mrb[16].mxu1 %vm830_vm2, %v1052_v23 }
 0x3a1   : > { %v2026_v25 = vpop.eup %2025  ;;  %1869 = vmatpush3.bf16.msra.mxu1 %v1206_v24  ;;  %1870 = vmatprep.mubr.msk.bf16.mxu1 %vm2289_vm0, %v2288_v0 }
 0x3a2   : > { %v1045_v26 = vsel %vm830_vm2, %v2026_v25, 0.0  ;;  %v1053_v27 = vpack.c.bf16 %v2026_v25, %v2026_v25  ;;  %1882 = vmatprep.subr.bf16.mxu1 %v2288_v0 }
 0x3a3   : > { %1046 = vadd.xlane.f32.xlu1 %v1045_v26  ;;  %v1759_v26 = vld [vmem:[%s2866_s13] ss:$0 sm:$0xff] }
 0x3a4   : > { %1865 = vmatmul.mubr.msk.bf16.vlgmr.msra.gmra.mrb[12].mxu0 %vm830_vm2, %v1053_v27 }
 0x3a5   : > { %v2028_v28 = vpop.eup %2027  ;;  %1878 = vmatprep.mubr.msk.bf16.mxu0 %vm2289_vm0, %v2288_v0  ;;  %1875 = vmatpush3.bf16.msra.mxu0 %v2013_v38 }
 0x3a6   : > { %v1048_v29 = vsel %vm830_vm2, %v2028_v28, 0.0  ;;  %v1054_v30 = vpack.c.bf16 %v2028_v28, %v2028_v28  ;;  %1876 = vmatprep.subr.bf16.mxu0 %v2288_v0  ;;  %v1760_v28 = vld [vmem:[%s2921_s1] ss:$0 sm:$0xff] }
 0x3a7   : > { %1049 = vadd.xlane.f32.xlu0 %v1048_v29 }
 0x3a8   : > { %1871 = vmatmul.mubr.msk.bf16.vlgmr.msra.gmra.mrb[20].mxu1 %vm830_vm2, %v1054_v30 }
 0x3a9   : > { %1886 = vmatprep.mubr.msk.bf16.mxu1 %vm2289_vm0, %v2288_v0  ;;  %1877 = vmatpush3.bf16.msra.mxu0 %v2014_v40 }
 0x3aa   : > { %1890 = vmatprep.subr.bf16.mxu0 %v2288_v0  ;;  %1883 = vmatpush3.bf16.msra.mxu1 %v2015_v3 }
 0x3ab   : > { %1040 = vadd.xlane.f32.xlu0 %v1039_v31  ;;  %1884 = vmatprep.subr.bf16.mxu1 %v2288_v0 }
 0x3ae   : > { %1885 = vmatpush3.bf16.msra.mxu1 %v2016_v21 }
 0x401   : > { %v1098_v32 = vpop.f32.mrb[8].mxu0 }
 0x402   : > { %v1854_v33 = vpop.f32.mrb[9].mxu0 }
 0x403   : > { %v1101_v34 = vpop.f32.mrb[10].mxu0  ;;  %v2018_v33 = vld [vmem:[%s2922_s18 + $0x8] sm:$0xff]  }
 0x404   : > { %v1855_v35 = vpop.f32.mrb[11].mxu0  ;;  %v2019_v34 = vld [vmem:[%s2922_s18 + $0x10] sm:$0xff]  }
 0x405   : > { %v2020_v35 = vld [vmem:[%s2922_s18 + $0x18] sm:$0xff]  }
 0x42c   : > { %v1044_v36 = vpop.xlane.xlu0 %1043 }
 0x42d   : > { %2029 = vrcp.f32 %v1044_v36  ;;  %v1761_v36 = vld [vmem:[%s2923_s24] ss:$0 sm:$0xff] }
 0x430   : > { %v1047_v37 = vpop.xlane.xlu1 %1046 }
 0x431   : > { %2031 = vrcp.f32 %v1047_v37 }
 0x434   : > { %v1050_v39 = vpop.xlane.xlu0 %1049 }
 0x435   : > { %2033 = vrcp.f32 %v1050_v39 }
 0x437   : > { %v2030_v41 = vpop.eup %2029 }
 0x438   : > { %v1041_v59 = vpop.xlane.xlu0 %1040 }
 0x439   : > { %2035 = vrcp.f32 %v1041_v59 }
 0x43b   : > { %v2032_v47 = vpop.eup %2031 }
 0x43f   : > { %v2034_v53 = vpop.eup %2033 }
 0x443   : > { %v2036_v60 = vpop.eup %2035 }
 0x444   : > { %v1252_v62 = vmul.f32 %v2036_v60, %v1098_v32  ;;  %v2017_v32 = vld [vmem:[%s2922_s18] sm:$0xff]  }
 0x473   : > { %v1146_v42 = vpop.f32.mrb[16].mxu1 }
 0x474   : > { %v1253_v43 = vmul.f32 %v2030_v41, %v1146_v42  ;;  %v1860_v44 = vpop.f32.mrb[17].mxu1 }
 0x475   : > { %v1149_v45 = vpop.f32.mrb[18].mxu1 }
 0x476   : > { %1257 = vrot.lane.b32.xlu1 %v1253_v43, %s2294_s0  ;;  %v1861_v46 = vpop.f32.mrb[19].mxu1  ;;  %s1774_s0 = sshll.u32 %s2273_s27, 6  ;;  %s2297_s27 = smov [#allocation11]  }
 0x477   : > { %v1194_v48 = vpop.f32.mrb[12].mxu0  ;;  %s2804_s24 = scalar_lea.hbm %s2927_s8, %s1774_s0 }
 0x478   : > { %v1254_v49 = vmul.f32 %v2032_v47, %v1194_v48  ;;  %v1866_v50 = vpop.f32.mrb[13].mxu0 }
 0x479   : > { %v1197_v51 = vpop.f32.mrb[14].mxu0 }
 0x47a   : > { %v1867_v52 = vpop.f32.mrb[15].mxu0  ;;  %1261 = vrot.lane.b32.xlu0 %v1254_v49, %s2295_s10  ;;  %v1765_v51 = vld [vmem:[%s2924_s14] ss:$0 sm:$0xff]  ;;  %s665_s10 = scalar_lea.vmem [#allocation11], %s2623_s20  ;;  %s2191_s20 = sshll.u32 %s2297_s27, 4  ;;  %s2192_s20 = int_to_ptr.vmem [resolvable:$false] %s2191_s20 }
 0x47b   : > { %v1242_v54 = vpop.f32.mrb[20].mxu1  ;;  %s2193_s14 = scalar_lea.vmem %s2192_s20, 128 }
 0x47c   : > { %v1255_v55 = vmul.f32 %v2034_v53, %v1242_v54  ;;  %v1872_v56 = vpop.f32.mrb[21].mxu1 }
 0x47d   : > { %v1245_v57 = vpop.f32.mrb[22].mxu1 }
 0x47e   : > { %1265 = vrot.lane.b32.xlu1 %v1255_v55, %s2296_s28  ;;  %v1873_v58 = vpop.f32.mrb[23].mxu1  ;;  %s1580_s28 = sshll.u32 %s665_s10, 4  ;;  %s2806_s28 = int_to_ptr.vmem [resolvable:$true] %s1580_s28 }
 0x47f   : > { %s2187_s15 = scalar_lea.vmem %s2806_s28, 64  ;;  %p2194_p12 = scmp.lt.s32.totalorder %s2806_s28, %s2192_s20 }
 0x480   : > { %p2188_p10 = scmp.ne.s32.totalorder %s2806_s28, %s2187_s15  ;;  %p2195_p4 = scmp.lt.s32.totalorder %s2193_s14, %s2187_s15 }
 0x482   : > { %p2189_p9 = pnand %p2188_p10, %p2928_p13  ;;  %p2196_p6 = por %p2195_p4, %p2194_p12 }
 0x484   : > { %p2190_p7 = pneg %p2189_p9 }
 0x486   : > { %p2197_p2 = pnand %p2196_p6, %p2190_p7 }
 0x4e8   : > { %v1258_v61 = vpop.permute.xlu1 %1257 }
 0x4e9   : > { %v1268_v1 = vsel %vm830_vm2, %v1252_v62, %v1258_v61 }
 0x4ec   : > { %v1262_v63 = vpop.permute.xlu0 %1261 }
 0x4ed   : > { %v1270_v2 = vsel %vm1269_vm4, %v1268_v1, %v1262_v63 }
 0x4f0   : > { %v1266_v4 = vpop.permute.xlu1 %1265 }
 0x4f1   : > { %v1272_v5 = vsel %vm1271_vm5, %v1270_v2, %v1266_v4 }
 0x4f2   : > { %v1273_v6 = vpack.c.bf16 %v1272_v5, %v1272_v5 }
 0x4f4   : > { %1879 = vmatmul.mubr.msk.bf16.vlgmr.msra.gmra.mrb[16].mxu0 %vm698_vm1, %v1273_v6  ;;  %v1771_v6 = vld [vmem:[%s2925_s16] ss:$0 sm:$0xff] }
 0x4f5   : > { %1898 = vmatprep.mubr.msk.bf16.mxu0 %vm2289_vm0, %v2288_v0  ;;  %1891 = vmatpush3.bf16.msra.mxu0 %v2017_v32 }
 0x4f6   : > { %1892 = vmatprep.subr.bf16.mxu0 %v2288_v0 }
 0x4f9   : > { %1893 = vmatpush3.bf16.msra.mxu0 %v2018_v33 }
 0x4fa   : > { %1894 = vmatprep.subr.bf16.mxu0 %v2288_v0 }
 0x4fd   : > { %1895 = vmatpush3.bf16.msra.mxu0 %v2019_v34 }
 0x4fe   : > { %1896 = vmatprep.subr.bf16.mxu0 %v2288_v0 }
 0x501   : > { %1897 = vmatpush3.bf16.msra.mxu0 %v2020_v35 }
 0x5c7   : > { %v1334_v9 = vpop.f32.mrb[16].mxu0 }
 0x5c8   : > { %v1335_v10 = vadd.f32 %v1755_v7, %v1334_v9  ;;  %v1880_v11 = vpop.f32.mrb[17].mxu0 }
 0x5c9   : > { %v1337_v12 = vpop.f32.mrb[18].mxu0 }
 0x5ca   : > { %v1881_v13 = vpop.f32.mrb[19].mxu0  ;;  %v1341_v14 = vadd.f32 %v1340_v8, %v1335_v10  ;;  %v1772_v8 = vld [vmem:[%s2926_s22] ss:$0 sm:$0xff] }
 0x5cc   : > { %v1344_v15 = vsel %vm698_vm1, %v1341_v14, 0.0 }
 0x5cd   : > { %1345 = vadd.xlane.f32.xlu1 %v1344_v15 }
 0x65a   : > { %v1346_v16 = vpop.xlane.xlu1 %1345 }
 0x65b   : > { %v1348_v17 = vmul.f32 0.03125, %v1346_v16 }
 0x65d   : > { %v1349_v18 = vsub.f32 %v1341_v14, %v1348_v17 }
 0x65f   : > { %v1350_v19 = vmul.f32 %v1349_v18, %v1349_v18 }
 0x661   : > { %v1351_v20 = vsel %vm698_vm1, %v1350_v19, 0.0 }
 0x662   : > { %1352 = vadd.xlane.f32.xlu0 %v1351_v20 }
 0x6ef   : > { %v1353_v22 = vpop.xlane.xlu0 %1352 }
 0x6f0   : > { %v1354_v23 = vmul.f32 0.03125, %v1353_v22 }
 0x6f2   : > { %v1355_v24 = vadd.f32 1e-05, %v1354_v23 }
 0x6f4   : > { %2037 = vrsqrt.f32 %v1355_v24 }
 0x6fe   : > { %v2038_v25 = vpop.eup %2037 }
 0x6ff   : > { %v1357_v27 = vmul.f32 %v2038_v25, %v1349_v18 }
 0x701   : > { %v1364_v29 = vmul.f32 %v1759_v26, %v1357_v27 }
 0x703   : > { %v1371_v30 = vadd.f32 %v1760_v28, %v1364_v29 }
 0x705   : > { %v1372_v31 = vpack.c.bf16 %v1371_v30, %v1371_v30 }
 0x707   : > { %1887 = vmatmul.mubr.msk.bf16.vlgmr.msra.gmra.mrb[24].mxu1 %vm698_vm1, %v1372_v31 }
 0x7da   : > { %v1433_v37 = vpop.f32.mrb[24].mxu1 }
 0x7db   : > { %v1434_v38 = vadd.f32 %v1761_v36, %v1433_v37  ;;  %v1888_v39 = vpop.f32.mrb[25].mxu1 }
 0x7dc   : > { %v1436_v40 = vpop.f32.mrb[26].mxu1 }
 0x7dd   : > { %v1439_v41 = vmul.f32 %v1434_v38, %v1434_v38  ;;  %v1889_v42 = vpop.f32.mrb[27].mxu1 }
 0x7df   : > { %v1440_v43 = vmul.f32 %v1439_v41, %v1434_v38 }
 0x7e1   : > { %v1441_v44 = vmul.f32 0.044715, %v1440_v43 }
 0x7e3   : > { %v1442_v45 = vadd.f32 %v1441_v44, %v1434_v38 }
 0x7e5   : > { %v1443_v46 = vmul.f32 0.7978846, %v1442_v45 }
 0x7e7   : > { %2039 = vtanh.f32 %v1443_v46 }
 0x7f1   : > { %v2040_v0 = vpop.eup %2039 }
 0x7f2   : > { %v1445_v47 = vadd.f32 1.0, %v2040_v0 }
 0x7f4   : > { %v1446_v48 = vmul.f32 0.5, %v1445_v47 }
 0x7f6   : > { %v1447_v49 = vmul.f32 %v1446_v48, %v1434_v38 }
 0x7f8   : > { %v1448_v50 = vpack.c.bf16 %v1447_v49, %v1447_v49 }
 0x7fa   : > { %1899 = vmatmul.mubr.msk.bf16.vlgmr.msra.gmra.mrb[20].mxu0 %vm1488_vm6, %v1448_v50 }
 0x8cd   : > { %v1526_v52 = vpop.f32.mrb[20].mxu0 }
 0x8ce   : > { %v1527_v53 = vadd.f32 %v1765_v51, %v1526_v52  ;;  %v1900_v54 = vpop.f32.mrb[21].mxu0 }
 0x8cf   : > { %v1529_v55 = vpop.f32.mrb[22].mxu0 }
 0x8d0   : > { %v1901_v56 = vpop.f32.mrb[23].mxu0  ;;  %v1532_v57 = vadd.f32 %v1527_v53, %v1371_v30 }
 0x8d2   : > { %v1535_v58 = vsel %vm698_vm1, %v1532_v57, 0.0 }
 0x8d3   : > { %1536 = vadd.xlane.f32.xlu0 %v1535_v58 }
 0x960   : > { %v1537_v59 = vpop.xlane.xlu0 %1536 }
 0x961   : > { %v1538_v60 = vmul.f32 0.03125, %v1537_v59 }
 0x963   : > { %v1539_v61 = vsub.f32 %v1532_v57, %v1538_v60 }
 0x965   : > { %v1540_v62 = vmul.f32 %v1539_v61, %v1539_v61 }
 0x967   : > { %v1541_v63 = vsel %vm698_vm1, %v1540_v62, 0.0 }
 0x968   : > { %1542 = vadd.xlane.f32.xlu1 %v1541_v63 }
 0x9f5   : > { %v1543_v1 = vpop.xlane.xlu1 %1542 }
 0x9f6   : > { %v1544_v2 = vmul.f32 0.03125, %v1543_v1 }
 0x9f8   : > { %v1545_v4 = vadd.f32 1e-05, %v1544_v2 }
 0x9fa   : > { %2041 = vrsqrt.f32 %v1545_v4 }
 0xa04   : > { %v2042_v5 = vpop.eup %2041 }
 0xa05   : > { %v1547_v7 = vmul.f32 %v2042_v5, %v1539_v61 }
 0xa07   : > { %v1554_v9 = vmul.f32 %v1771_v6, %v1547_v7 }
 0xa09   : > { %v1561_v10 = vadd.f32 %v1772_v8, %v1554_v9 }
 0xa0b   : > { %v1562_v11 = vpack.c.bf16 %v1561_v10, %v1561_v10 }
 0xa0d   : > { %1564 = vst.msk [vmem:[%s665_s10] sm:$0xf] %vm1563_vm7, %v1562_v11 }
 0xa0e   : > { %2200 = shalt.err (!%p2197_p2)
}
 0xa0f   : > { %s2201_s21 = scalar_lea.hbm %s2804_s24, 64  ;;  %s2205_s16 = scalar_lea.hbm %s2927_s8, 128 }
 0xa10   : > { %p2202_p1 = scmp.ne.s32.totalorder %s2804_s24, %s2201_s21  ;;  %p2206_p11 = scmp.lt.u32.totalorder %s2804_s24, %s2927_s8 }
 0xa11   : > { %p2207_p0 = scmp.lt.u32.totalorder %s2205_s16, %s2201_s21  ;;  %p2209_p10 = scmp.lt.u32.totalorder %s2201_s21, %s2804_s24 }
 0xa12   : > { %p2203_p8 = pnand %p2202_p1, %p2928_p13 }
 0xa13   : > { %p2208_p5 = por %p2207_p0, %p2206_p11 }
 0xa14   : > { %p2204_p3 = pneg %p2203_p8 }
 0xa15   : > { %p2210_p9 = por %p2209_p10, %p2208_p5 }
 0xa17   : > { %p2211_p7 = pnand %p2210_p9, %p2204_p3 }
 0xa19   : > { %2214 = shalt.err (!%p2211_p7)
}
 0xa1a   : > { %1918 = dma.vmem_to_hbm [thread:$0]  (%p2928_p13), %s2806_s28, 64, %s2804_s24, %s1566_s11  }
 0xa1b PF: > { %s2929_s22 = sld [smem:[#allocation17_spill]]  ;;  %s2930_s0 = sld [smem:[#allocation20_spill]] }
 0xa1c   : > { %p2932_p4 = scmp.ge.s32.totalorder %s2281_s29, 2 }
 0xa21   : > { %s1592_s10 = sand.u32 1, %s2929_s22   ;;  %p2931_p12 = scmp.ne.s32.totalorder %s2930_s0, 0 }
 0xa22   : > { %s1593_s19 = scalar_lea.sflag [#allocation4], %s1592_s10 }
 0xa23   : > { %p1938_p6 = pnand %p2932_p4, %p2931_p12 }
 0xa25   : > { %2256 = dma.done.wait (!%p1938_p6), %s1593_s19, 64  }
 0xa26   : > { %2258 = vsyncadd (!%p1938_p6), %s1593_s19, 4294967232  ;;  %s37_s29 = sadd.s32 1, %s2281_s29   ;;  %s2933_s26 = sld [smem:[#allocation18_spill]] }
 0xa27   : > { %p34_p2 = scmp.ge.s32.totalorder %s37_s29, 4   ;;  %s2934_s30 = sld [smem:[#allocation22_spill]] }
 0xa28   : > { %s2935_s27 = sld [smem:[#allocation19_spill]]  ;;  %s2936_s28 = sld [smem:[#allocation21_spill]] }
 0xa29   : > { %s2937_s24 = smov %s2265_s25  ;;  %36 = sbr.rel (!%p34_p2) target bundleno = 22 (0x16), region = 161 }
 0xa2c   : > { %s2938_s25 = smov %s2933_s26 }
 0xa2d   : > { %s2939_s26 = smov %s2934_s30 }
 0xa30   :  { %1598 = vsyncpa [#allocation3], 1 }
 0xa31   :  { %1600 = vsyncpa [#allocation3 + $0x1], 1 }
 0xa32   :  { %1601 = vsyncpa [#allocation6], 1 }
 0xa33   :  { %1603 = vsyncpa [#allocation6 + $0x1], 1 }
 0xa34   :  { %1604 = vsyncpa [#allocation9], 1 }
 0xa35   :  { %1605 = vsyncpa [#allocation4], 1 }
 0xa36   :  { %1607 = vsyncpa [#allocation4 + $0x1], 1 }

</bundles_post_ra>
